<compile_context>
chip_gen: v6e
topology: v6e:2x2x1
jax: 0.10.0
libtpu: 0.0.40
codegen_flags: <defaults>
</compile_context>

<pallas_src>
import functools

import jax
import jax.numpy as jnp
from jax import lax
from jax.experimental import pallas as pl
from jax.experimental.pallas import tpu as pltpu


def _round_up(x, m):
    return (x + m - 1) // m * m


def _largest_divisor_le(n, cap):
    for d in range(min(int(cap), n), 0, -1):
        if n % d == 0:
            return d
    return 1


def _vmem_limit_bytes(est_bytes):
    """Generation-aware scoped-VMEM request with headroom for Mosaic scratch."""
    try:
        cap = int(pltpu.get_tpu_info().vmem_capacity_bytes)
    except Exception:
        cap = 48 << 20          # conservative fallback, below v7x 64 MiB
    hard_cap = (cap * 7) // 8   # leave compiler-internal-scratch headroom
    return int(min(max(est_bytes + (2 << 20), 16 << 20), hard_cap))


def _cornn_kernel(TU, act_fn, mxu_dtype,
                  x_ref, wx_ref, wy_ref, b_ref, out_ref, hy_ref, xw_ref):
    """Grid = (batch_blocks [parallel], time_blocks [sequential]).

    Per grid step:
      1) one large MXU call: XW = x_block @ Wx + (bx+by)   (M = TU*TB rows),
         written to xw_ref (VMEM scratch); bias broadcast happens once.
      2) TU serial recurrence steps hy = act(XW[i] + hy @ Wy), hy held as a
         fori_loop vreg carry; hy_ref is read/written once per grid step so
         the state survives across time blocks.
    """
    t_blk = pl.program_id(1)

    @pl.when(t_blk == 0)
    def _():
        hy_ref[...] = jnp.zeros_like(hy_ref)

    TB, H_p = hy_ref.shape
    n_inp_p = x_ref.shape[2]

    # (1) hoisted input projection — half the FLOPs in one well-shaped matmul.
    x_flat = x_ref[...].reshape(TU * TB, n_inp_p)
    xw = jnp.dot(x_flat, wx_ref[...], preferred_element_type=jnp.float32)
    xw_ref[...] = (xw + b_ref[...]).reshape(TU, TB, H_p)

    wy = wy_ref[...]            # loaded once per grid step, VMEM-resident

    # (2) serial recurrence: only K = H_p on the latency-critical chain.
    def step(i, hy):
        pre = xw_ref[i] + jnp.dot(hy.astype(mxu_dtype), wy,
                                  preferred_element_type=jnp.float32)
        return act_fn(pre)

    hy = lax.fori_loop(0, TU, step, hy_ref[...], unroll=True)
    hy_ref[...] = hy

    @pl.when(t_blk == pl.num_programs(1) - 1)
    def _():
        out_ref[...] = hy.astype(out_ref.dtype)


def cornn_forward(x, wx, bx, wy, by, wr, br, *,
                  time_unroll=16, batch_tile=None, act='tanh',
                  mxu_dtype=jnp.float32, single_buffer_weights=True):
    """coRNN forward (get_seq=False).

    x  : (T, B, n_inp)                          seq-first as in PyTorch forward
    wx : (n_inp, H), bx : (H,) or (1, H)        Wx stored pre-transposed
    wy : (H, H),     by : (H,) or (1, H)        Wy stored pre-transposed
    wr : (H, n_out), br : (n_out,) or (1, n_out)
    Returns (output, [], None) like the PyTorch module.

    batch_tile: leave None on v5e/v6e (1 TensorCore).  On v7x pass
    batch_tile = B_p // 2 only when that still leaves >= ~256 rows per core.
    mxu_dtype:  jnp.bfloat16 halves x HBM traffic / weight VMEM and doubles
    MXU rate, at a small numerics deviation from the f32 PyTorch reference.
    """
    T, B, n_inp = x.shape
    H = wx.shape[1]

    act_fn = {'tanh': jnp.tanh,
              'relu': lambda v: jnp.maximum(v, 0.0),
              'ident': lambda v: v}[act]

    f32 = jnp.float32
    n_inp_p = _round_up(n_inp, 128)
    H_p = _round_up(H, 128)
    B_p = _round_up(B, 8)

    # TU divides T exactly -> no per-step tail masking inside the kernel.
    TU = _largest_divisor_le(T, max(1, int(time_unroll)))
    n_t_blk = T // TU

    if batch_tile is None:
        TB = B_p
    else:
        TB = _round_up(int(batch_tile), 8)
        if B_p % TB != 0:
            TB = B_p
    n_b_blk = B_p // TB

    # Padded weights / fused bias.  Zero padding is exact: padded input
    # columns/rows contribute 0 and padded hidden columns stay 0 / are sliced.
    wx_p = jnp.zeros((n_inp_p, H_p), mxu_dtype).at[:n_inp, :H].set(
        wx.astype(mxu_dtype))
    wy_p = jnp.zeros((H_p, H_p), mxu_dtype).at[:H, :H].set(wy.astype(mxu_dtype))
    b_cat = jnp.zeros((1, H_p), f32).at[:, :H].set(
        (jnp.reshape(bx, (1, H)) + jnp.reshape(by, (1, H))).astype(f32))

    # Pad x only along dims that actually need it (avoid a second full HBM
    # copy when already lane/sublane aligned).
    x_c = x.astype(mxu_dtype)
    pad_b, pad_i = B_p - B, n_inp_p - n_inp
    if pad_b or pad_i:
        x_c = jnp.pad(x_c, ((0, 0), (0, pad_b), (0, pad_i)))

    itemsize = jnp.dtype(mxu_dtype).itemsize
    w_bufs = 1 if single_buffer_weights else 2
    est_bytes = (w_bufs * (wx_p.size + wy_p.size) * itemsize
                 + w_bufs * b_cat.size * 4
                 + 2 * TU * TB * n_inp_p * itemsize      # x, double-buffered
                 + 2 * TB * H_p * 4                      # out, double-buffered
                 + (TB * H_p + TU * TB * H_p) * 4)       # hy + XW scratches
    vmem_limit = _vmem_limit_bytes(est_bytes)

    kernel = functools.partial(_cornn_kernel, TU, act_fn, mxu_dtype)

    def const_spec(shape, single_buffer):
        idx = lambda b, t: tuple(0 for _ in shape)
        if single_buffer:
            try:
                # Constant across the grid -> single buffer halves weight VMEM
                # (matters for large H; Wy dominates).
                return pl.BlockSpec(shape, idx, pipeline_mode=pl.Buffered(1))
            except TypeError:       # pipeline_mode kwarg not supported
                pass
        return pl.BlockSpec(shape, idx)

    def build(single_buffer):
        return pl.pallas_call(
            kernel,
            out_shape=jax.ShapeDtypeStruct((B_p, H_p), f32),
            grid_spec=pltpu.PrefetchScalarGridSpec(
                num_scalar_prefetch=0,
                grid=(n_b_blk, n_t_blk),
                in_specs=[
                    pl.BlockSpec((TU, TB, n_inp_p), lambda b, t: (t, b, 0)),
                    const_spec((n_inp_p, H_p), single_buffer),   # Wx
                    const_spec((H_p, H_p), single_buffer),       # Wy
                    const_spec((1, H_p), single_buffer),         # bx + by
                ],
                out_specs=pl.BlockSpec((TB, H_p), lambda b, t: (b, 0)),
                scratch_shapes=[
                    pltpu.VMEM((TB, H_p), f32),       # hy (across time blocks)
                    pltpu.VMEM((TU, TB, H_p), f32),   # hoisted XW block
                ],
            ),
            compiler_params=pltpu.CompilerParams(
                dimension_semantics=("parallel", "arbitrary"),
                vmem_limit_bytes=vmem_limit,
            ),
        )

    if single_buffer_weights:
        try:
            hy_full = build(True)(x_c, wx_p, wy_p, b_cat)
        except (ValueError, NotImplementedError, pltpu.LoweringException):
            # Buffered(1) rejected by this Pallas build -> default double
            # buffering.  Unrelated errors recur below and are raised there,
            # so nothing is silently masked.
            hy_full = build(False)(x_c, wx_p, wy_p, b_cat)
    else:
        hy_full = build(False)(x_c, wx_p, wy_p, b_cat)

    hy = hy_full[:B, :H]
    # Readout stays in plain XLA: n_out (e.g. 10) is lane-sparse and Wr is
    # used once, so keeping it in-kernel would waste VMEM / force masked vst.
    output = hy @ wr.astype(f32) + jnp.reshape(br, (1, -1)).astype(f32)
    return output, [], None


def _ref_forward(x, wx, bx, wy, by, wr, br):
    hy = jnp.zeros((x.shape[1], wx.shape[1]), jnp.float32)
    for t in range(x.shape[0]):
        hy = jnp.tanh(x[t] @ wx + jnp.reshape(bx, (1, -1))
                      + hy @ wy + jnp.reshape(by, (1, -1)))
    return hy @ wr + jnp.reshape(br, (1, -1))


if __name__ == "__main__":
    # Small CIFAR-row-style shapes consistent with the module.
    T, B = 32, 8           # 32 rows fed sequentially
    n_inp = 96             # 32 pixels * 3 channels per row
    n_hid = 64             # spatial = sqrt(64) = 8 (only used by get_seq path)
    n_ch = 1
    n_out = 10
    H = n_hid * n_ch

    key = jax.random.PRNGKey(0)
    kx, kwx, kbx, kwr, kbr, kx2 = jax.random.split(key, 6)

    x = jax.random.normal(kx, (T, B, n_inp), dtype=jnp.float32)

    # Wx: nn.Linear(n_inp, H) — deterministic random stand-in, stored (n_inp,H).
    bound_x = 1.0 / jnp.sqrt(n_inp)
    wx = jax.random.uniform(kwx, (n_inp, H), jnp.float32, -bound_x, bound_x)
    bx = jax.random.uniform(kbx, (1, H), jnp.float32, -bound_x, bound_x)

    # Wy: init='eye' -> identity weight, zero bias (as in the module).
    wy = jnp.eye(H, dtype=jnp.float32)
    by = jnp.zeros((1, H), jnp.float32)

    # readout: nn.Linear(H, n_out), stored transposed (H, n_out).
    bound_r = 1.0 / jnp.sqrt(H)
    wr = jax.random.uniform(kwr, (H, n_out), jnp.float32, -bound_r, bound_r)
    br = jax.random.uniform(kbr, (1, n_out), jnp.float32, -bound_r, bound_r)

    # --- test 1: default single batch block, TU=16 ---
    out, y_seq, _ = cornn_forward(x, wx, bx, wy, by, wr, br, time_unroll=16)
    out = jax.block_until_ready(out)
    ref = _ref_forward(x, wx, bx, wy, by, wr, br)
    assert out.shape == (B, n_out)
    assert y_seq == []
    assert jnp.allclose(out, ref, atol=1e-4, rtol=1e-4), "mismatch (test 1)"

    # --- test 2: multiple batch blocks exercises the 'parallel' axis + the
    # per-batch-block hy re-zeroing (review correctness concern). ---
    B2 = 16
    x2 = jax.random.normal(kx2, (T, B2, n_inp), dtype=jnp.float32)
    out2, _, _ = cornn_forward(x2, wx, bx, wy, by, wr, br,
                               time_unroll=8, batch_tile=8)
    out2 = jax.block_until_ready(out2)
    ref2 = _ref_forward(x2, wx, bx, wy, by, wr, br)
    assert jnp.allclose(out2, ref2, atol=1e-4, rtol=1e-4), "mismatch (test 2)"

    # TODO(synk): get_seq=True per-step hidden-state collection (y_seq stack /
    # spatial reshape) is not materialized in-kernel; only get_seq=False path.

    print("KERNEL_OK")
</pallas_src>

<mosaic_0001>
module attributes {stable_mosaic.version = 11 : i64} {
  func.func @_cornn_kernel(%arg0: i32, %arg1: i32, %arg2: memref<16x8x128xf32, #tpu.memory_space<vmem>>, %arg3: memref<128x128xf32, #tpu.memory_space<vmem>>, %arg4: memref<128x128xf32, #tpu.memory_space<vmem>>, %arg5: memref<1x128xf32, #tpu.memory_space<vmem>>, %arg6: memref<8x128xf32, #tpu.memory_space<vmem>>, %arg7: memref<8x128xf32, #tpu.memory_space<vmem>>, %arg8: memref<16x8x128xf32, #tpu.memory_space<vmem>>) attributes {dimension_semantics = [#tpu.dimension_semantics<parallel>, #tpu.dimension_semantics<arbitrary>], iteration_bounds = array<i64: 1, 2>, scalar_prefetch = 0 : i64, scratch_operands = 2 : i64, tpu.core_type = #tpu.core_type<tc>, window_params = [{transform_indices = @transform_0, window_bounds = array<i64: 16, 8, 128>}, {pipeline_mode = #tpu.pipeline_mode<synchronous>, transform_indices = @transform_1, window_bounds = array<i64: 128, 128>}, {pipeline_mode = #tpu.pipeline_mode<synchronous>, transform_indices = @transform_2, window_bounds = array<i64: 128, 128>}, {pipeline_mode = #tpu.pipeline_mode<synchronous>, transform_indices = @transform_3, window_bounds = array<i64: 1, 128>}, {transform_indices = @transform_4, window_bounds = array<i64: 8, 128>}]} {
    %c0_i32 = arith.constant 0 : i32
    %0 = arith.cmpi eq, %arg1, %c0_i32 : i32
    %1 = arith.extui %0 : i1 to i32
    %c0_i32_0 = arith.constant 0 : i32
    %2 = arith.cmpi ne, %1, %c0_i32_0 : i32
    scf.if %2 {
      %cst_67 = arith.constant 0.000000e+00 : f32
      %114 = vector.broadcast %cst_67 : f32 to vector<8x128xf32>
      %c0_68 = arith.constant 0 : index
      %c0_69 = arith.constant 0 : index
      %115 = vector.load %arg7[%c0_68, %c0_69] : memref<8x128xf32, #tpu.memory_space<vmem>>, vector<8x128xf32>
      tpu.vector_store %arg7[%c0_68, %c0_69], %114 {strides = array<i32>} : memref<8x128xf32, #tpu.memory_space<vmem>>, vector<8x128xf32>,
    } else {
    }
    %c0 = arith.constant 0 : index
    %c0_1 = arith.constant 0 : index
    %c0_2 = arith.constant 0 : index
    %3 = vector.load %arg2[%c0, %c0_1, %c0_2] : memref<16x8x128xf32, #tpu.memory_space<vmem>>, vector<16x8x128xf32>
    %4 = vector.shape_cast %3 : vector<16x8x128xf32> to vector<128x128xf32>
    %c0_3 = arith.constant 0 : index
    %c0_4 = arith.constant 0 : index
    %5 = vector.load %arg3[%c0_3, %c0_4] : memref<128x128xf32, #tpu.memory_space<vmem>>, vector<128x128xf32>
    %cst = arith.constant dense<0.000000e+00> : vector<128x128xf32>
    %6 = tpu.matmul %4, %5, %cst {dimension_numbers = #tpu.dot_dimension_numbers<[1], [0], [0], [1], [0, 0, 1, 1], [], []>} : vector<128x128xf32>, vector<128x128xf32>, vector<128x128xf32> -> vector<128x128xf32>
    %c0_5 = arith.constant 0 : index
    %c0_6 = arith.constant 0 : index
    %7 = vector.load %arg5[%c0_5, %c0_6] : memref<1x128xf32, #tpu.memory_space<vmem>>, vector<1x128xf32>
    %8 = vector.broadcast %7 : vector<1x128xf32> to vector<128x128xf32>
    %9 = arith.addf %6, %8 : vector<128x128xf32>
    %10 = vector.shape_cast %9 : vector<128x128xf32> to vector<16x8x128xf32>
    %c0_7 = arith.constant 0 : index
    %c0_8 = arith.constant 0 : index
    %c0_9 = arith.constant 0 : index
    %11 = vector.load %arg8[%c0_7, %c0_8, %c0_9] : memref<16x8x128xf32, #tpu.memory_space<vmem>>, vector<16x8x128xf32>
    tpu.vector_store %arg8[%c0_7, %c0_8, %c0_9], %10 {strides = array<i32>} : memref<16x8x128xf32, #tpu.memory_space<vmem>>, vector<16x8x128xf32>,
    %c0_10 = arith.constant 0 : index
    %c0_11 = arith.constant 0 : index
    %12 = vector.load %arg4[%c0_10, %c0_11] : memref<128x128xf32, #tpu.memory_space<vmem>>, vector<128x128xf32>
    %c0_12 = arith.constant 0 : index
    %c0_13 = arith.constant 0 : index
    %13 = vector.load %arg7[%c0_12, %c0_13] : memref<8x128xf32, #tpu.memory_space<vmem>>, vector<8x128xf32>
    %c0_i32_14 = arith.constant 0 : i32
    %14 = arith.index_cast %c0_i32_14 : i32 to index
    %c0_15 = arith.constant 0 : index
    %c0_16 = arith.constant 0 : index
    %15 = vector.load %arg8[%14, %c0_15, %c0_16] : memref<16x8x128xf32, #tpu.memory_space<vmem>>, vector<1x8x128xf32>
    %16 = vector.shape_cast %15 : vector<1x8x128xf32> to vector<8x128xf32>
    %cst_17 = arith.constant dense<0.000000e+00> : vector<8x128xf32>
    %17 = tpu.matmul %13, %12, %cst_17 {dimension_numbers = #tpu.dot_dimension_numbers<[1], [0], [0], [1], [0, 0, 1, 1], [], []>} : vector<8x128xf32>, vector<128x128xf32>, vector<8x128xf32> -> vector<8x128xf32>
    %18 = arith.addf %16, %17 : vector<8x128xf32>
    %19 = math.tanh %18 : vector<8x128xf32>
    %c1_i32 = arith.constant 1 : i32
    %20 = arith.index_cast %c1_i32 : i32 to index
    %c0_18 = arith.constant 0 : index
    %c0_19 = arith.constant 0 : index
    %21 = vector.load %arg8[%20, %c0_18, %c0_19] : memref<16x8x128xf32, #tpu.memory_space<vmem>>, vector<1x8x128xf32>
    %22 = vector.shape_cast %21 : vector<1x8x128xf32> to vector<8x128xf32>
    %cst_20 = arith.constant dense<0.000000e+00> : vector<8x128xf32>
    %23 = tpu.matmul %19, %12, %cst_20 {dimension_numbers = #tpu.dot_dimension_numbers<[1], [0], [0], [1], [0, 0, 1, 1], [], []>} : vector<8x128xf32>, vector<128x128xf32>, vector<8x128xf32> -> vector<8x128xf32>
    %24 = arith.addf %22, %23 : vector<8x128xf32>
    %25 = math.tanh %24 : vector<8x128xf32>
    %c2_i32 = arith.constant 2 : i32
    %26 = arith.index_cast %c2_i32 : i32 to index
    %c0_21 = arith.constant 0 : index
    %c0_22 = arith.constant 0 : index
    %27 = vector.load %arg8[%26, %c0_21, %c0_22] : memref<16x8x128xf32, #tpu.memory_space<vmem>>, vector<1x8x128xf32>
    %28 = vector.shape_cast %27 : vector<1x8x128xf32> to vector<8x128xf32>
    %cst_23 = arith.constant dense<0.000000e+00> : vector<8x128xf32>
    %29 = tpu.matmul %25, %12, %cst_23 {dimension_numbers = #tpu.dot_dimension_numbers<[1], [0], [0], [1], [0, 0, 1, 1], [], []>} : vector<8x128xf32>, vector<128x128xf32>, vector<8x128xf32> -> vector<8x128xf32>
    %30 = arith.addf %28, %29 : vector<8x128xf32>
    %31 = math.tanh %30 : vector<8x128xf32>
    %c3_i32 = arith.constant 3 : i32
    %32 = arith.index_cast %c3_i32 : i32 to index
    %c0_24 = arith.constant 0 : index
    %c0_25 = arith.constant 0 : index
    %33 = vector.load %arg8[%32, %c0_24, %c0_25] : memref<16x8x128xf32, #tpu.memory_space<vmem>>, vector<1x8x128xf32>
    %34 = vector.shape_cast %33 : vector<1x8x128xf32> to vector<8x128xf32>
    %cst_26 = arith.constant dense<0.000000e+00> : vector<8x128xf32>
    %35 = tpu.matmul %31, %12, %cst_26 {dimension_numbers = #tpu.dot_dimension_numbers<[1], [0], [0], [1], [0, 0, 1, 1], [], []>} : vector<8x128xf32>, vector<128x128xf32>, vector<8x128xf32> -> vector<8x128xf32>
    %36 = arith.addf %34, %35 : vector<8x128xf32>
    %37 = math.tanh %36 : vector<8x128xf32>
    %c4_i32 = arith.constant 4 : i32
    %38 = arith.index_cast %c4_i32 : i32 to index
    %c0_27 = arith.constant 0 : index
    %c0_28 = arith.constant 0 : index
    %39 = vector.load %arg8[%38, %c0_27, %c0_28] : memref<16x8x128xf32, #tpu.memory_space<vmem>>, vector<1x8x128xf32>
    %40 = vector.shape_cast %39 : vector<1x8x128xf32> to vector<8x128xf32>
    %cst_29 = arith.constant dense<0.000000e+00> : vector<8x128xf32>
    %41 = tpu.matmul %37, %12, %cst_29 {dimension_numbers = #tpu.dot_dimension_numbers<[1], [0], [0], [1], [0, 0, 1, 1], [], []>} : vector<8x128xf32>, vector<128x128xf32>, vector<8x128xf32> -> vector<8x128xf32>
    %42 = arith.addf %40, %41 : vector<8x128xf32>
    %43 = math.tanh %42 : vector<8x128xf32>
    %c5_i32 = arith.constant 5 : i32
    %44 = arith.index_cast %c5_i32 : i32 to index
    %c0_30 = arith.constant 0 : index
    %c0_31 = arith.constant 0 : index
    %45 = vector.load %arg8[%44, %c0_30, %c0_31] : memref<16x8x128xf32, #tpu.memory_space<vmem>>, vector<1x8x128xf32>
    %46 = vector.shape_cast %45 : vector<1x8x128xf32> to vector<8x128xf32>
    %cst_32 = arith.constant dense<0.000000e+00> : vector<8x128xf32>
    %47 = tpu.matmul %43, %12, %cst_32 {dimension_numbers = #tpu.dot_dimension_numbers<[1], [0], [0], [1], [0, 0, 1, 1], [], []>} : vector<8x128xf32>, vector<128x128xf32>, vector<8x128xf32> -> vector<8x128xf32>
    %48 = arith.addf %46, %47 : vector<8x128xf32>
    %49 = math.tanh %48 : vector<8x128xf32>
    %c6_i32 = arith.constant 6 : i32
    %50 = arith.index_cast %c6_i32 : i32 to index
    %c0_33 = arith.constant 0 : index
    %c0_34 = arith.constant 0 : index
    %51 = vector.load %arg8[%50, %c0_33, %c0_34] : memref<16x8x128xf32, #tpu.memory_space<vmem>>, vector<1x8x128xf32>
    %52 = vector.shape_cast %51 : vector<1x8x128xf32> to vector<8x128xf32>
    %cst_35 = arith.constant dense<0.000000e+00> : vector<8x128xf32>
    %53 = tpu.matmul %49, %12, %cst_35 {dimension_numbers = #tpu.dot_dimension_numbers<[1], [0], [0], [1], [0, 0, 1, 1], [], []>} : vector<8x128xf32>, vector<128x128xf32>, vector<8x128xf32> -> vector<8x128xf32>
    %54 = arith.addf %52, %53 : vector<8x128xf32>
    %55 = math.tanh %54 : vector<8x128xf32>
    %c7_i32 = arith.constant 7 : i32
    %56 = arith.index_cast %c7_i32 : i32 to index
    %c0_36 = arith.constant 0 : index
    %c0_37 = arith.constant 0 : index
    %57 = vector.load %arg8[%56, %c0_36, %c0_37] : memref<16x8x128xf32, #tpu.memory_space<vmem>>, vector<1x8x128xf32>
    %58 = vector.shape_cast %57 : vector<1x8x128xf32> to vector<8x128xf32>
    %cst_38 = arith.constant dense<0.000000e+00> : vector<8x128xf32>
    %59 = tpu.matmul %55, %12, %cst_38 {dimension_numbers = #tpu.dot_dimension_numbers<[1], [0], [0], [1], [0, 0, 1, 1], [], []>} : vector<8x128xf32>, vector<128x128xf32>, vector<8x128xf32> -> vector<8x128xf32>
    %60 = arith.addf %58, %59 : vector<8x128xf32>
    %61 = math.tanh %60 : vector<8x128xf32>
    %c8_i32 = arith.constant 8 : i32
    %62 = arith.index_cast %c8_i32 : i32 to index
    %c0_39 = arith.constant 0 : index
    %c0_40 = arith.constant 0 : index
    %63 = vector.load %arg8[%62, %c0_39, %c0_40] : memref<16x8x128xf32, #tpu.memory_space<vmem>>, vector<1x8x128xf32>
    %64 = vector.shape_cast %63 : vector<1x8x128xf32> to vector<8x128xf32>
    %cst_41 = arith.constant dense<0.000000e+00> : vector<8x128xf32>
    %65 = tpu.matmul %61, %12, %cst_41 {dimension_numbers = #tpu.dot_dimension_numbers<[1], [0], [0], [1], [0, 0, 1, 1], [], []>} : vector<8x128xf32>, vector<128x128xf32>, vector<8x128xf32> -> vector<8x128xf32>
    %66 = arith.addf %64, %65 : vector<8x128xf32>
    %67 = math.tanh %66 : vector<8x128xf32>
    %c9_i32 = arith.constant 9 : i32
    %68 = arith.index_cast %c9_i32 : i32 to index
    %c0_42 = arith.constant 0 : index
    %c0_43 = arith.constant 0 : index
    %69 = vector.load %arg8[%68, %c0_42, %c0_43] : memref<16x8x128xf32, #tpu.memory_space<vmem>>, vector<1x8x128xf32>
    %70 = vector.shape_cast %69 : vector<1x8x128xf32> to vector<8x128xf32>
    %cst_44 = arith.constant dense<0.000000e+00> : vector<8x128xf32>
    %71 = tpu.matmul %67, %12, %cst_44 {dimension_numbers = #tpu.dot_dimension_numbers<[1], [0], [0], [1], [0, 0, 1, 1], [], []>} : vector<8x128xf32>, vector<128x128xf32>, vector<8x128xf32> -> vector<8x128xf32>
    %72 = arith.addf %70, %71 : vector<8x128xf32>
    %73 = math.tanh %72 : vector<8x128xf32>
    %c10_i32 = arith.constant 10 : i32
    %74 = arith.index_cast %c10_i32 : i32 to index
    %c0_45 = arith.constant 0 : index
    %c0_46 = arith.constant 0 : index
    %75 = vector.load %arg8[%74, %c0_45, %c0_46] : memref<16x8x128xf32, #tpu.memory_space<vmem>>, vector<1x8x128xf32>
    %76 = vector.shape_cast %75 : vector<1x8x128xf32> to vector<8x128xf32>
    %cst_47 = arith.constant dense<0.000000e+00> : vector<8x128xf32>
    %77 = tpu.matmul %73, %12, %cst_47 {dimension_numbers = #tpu.dot_dimension_numbers<[1], [0], [0], [1], [0, 0, 1, 1], [], []>} : vector<8x128xf32>, vector<128x128xf32>, vector<8x128xf32> -> vector<8x128xf32>
    %78 = arith.addf %76, %77 : vector<8x128xf32>
    %79 = math.tanh %78 : vector<8x128xf32>
    %c11_i32 = arith.constant 11 : i32
    %80 = arith.index_cast %c11_i32 : i32 to index
    %c0_48 = arith.constant 0 : index
    %c0_49 = arith.constant 0 : index
    %81 = vector.load %arg8[%80, %c0_48, %c0_49] : memref<16x8x128xf32, #tpu.memory_space<vmem>>, vector<1x8x128xf32>
    %82 = vector.shape_cast %81 : vector<1x8x128xf32> to vector<8x128xf32>
    %cst_50 = arith.constant dense<0.000000e+00> : vector<8x128xf32>
    %83 = tpu.matmul %79, %12, %cst_50 {dimension_numbers = #tpu.dot_dimension_numbers<[1], [0], [0], [1], [0, 0, 1, 1], [], []>} : vector<8x128xf32>, vector<128x128xf32>, vector<8x128xf32> -> vector<8x128xf32>
    %84 = arith.addf %82, %83 : vector<8x128xf32>
    %85 = math.tanh %84 : vector<8x128xf32>
    %c12_i32 = arith.constant 12 : i32
    %86 = arith.index_cast %c12_i32 : i32 to index
    %c0_51 = arith.constant 0 : index
    %c0_52 = arith.constant 0 : index
    %87 = vector.load %arg8[%86, %c0_51, %c0_52] : memref<16x8x128xf32, #tpu.memory_space<vmem>>, vector<1x8x128xf32>
    %88 = vector.shape_cast %87 : vector<1x8x128xf32> to vector<8x128xf32>
    %cst_53 = arith.constant dense<0.000000e+00> : vector<8x128xf32>
    %89 = tpu.matmul %85, %12, %cst_53 {dimension_numbers = #tpu.dot_dimension_numbers<[1], [0], [0], [1], [0, 0, 1, 1], [], []>} : vector<8x128xf32>, vector<128x128xf32>, vector<8x128xf32> -> vector<8x128xf32>
    %90 = arith.addf %88, %89 : vector<8x128xf32>
    %91 = math.tanh %90 : vector<8x128xf32>
    %c13_i32 = arith.constant 13 : i32
    %92 = arith.index_cast %c13_i32 : i32 to index
    %c0_54 = arith.constant 0 : index
    %c0_55 = arith.constant 0 : index
    %93 = vector.load %arg8[%92, %c0_54, %c0_55] : memref<16x8x128xf32, #tpu.memory_space<vmem>>, vector<1x8x128xf32>
    %94 = vector.shape_cast %93 : vector<1x8x128xf32> to vector<8x128xf32>
    %cst_56 = arith.constant dense<0.000000e+00> : vector<8x128xf32>
    %95 = tpu.matmul %91, %12, %cst_56 {dimension_numbers = #tpu.dot_dimension_numbers<[1], [0], [0], [1], [0, 0, 1, 1], [], []>} : vector<8x128xf32>, vector<128x128xf32>, vector<8x128xf32> -> vector<8x128xf32>
    %96 = arith.addf %94, %95 : vector<8x128xf32>
    %97 = math.tanh %96 : vector<8x128xf32>
    %c14_i32 = arith.constant 14 : i32
    %98 = arith.index_cast %c14_i32 : i32 to index
    %c0_57 = arith.constant 0 : index
    %c0_58 = arith.constant 0 : index
    %99 = vector.load %arg8[%98, %c0_57, %c0_58] : memref<16x8x128xf32, #tpu.memory_space<vmem>>, vector<1x8x128xf32>
    %100 = vector.shape_cast %99 : vector<1x8x128xf32> to vector<8x128xf32>
    %cst_59 = arith.constant dense<0.000000e+00> : vector<8x128xf32>
    %101 = tpu.matmul %97, %12, %cst_59 {dimension_numbers = #tpu.dot_dimension_numbers<[1], [0], [0], [1], [0, 0, 1, 1], [], []>} : vector<8x128xf32>, vector<128x128xf32>, vector<8x128xf32> -> vector<8x128xf32>
    %102 = arith.addf %100, %101 : vector<8x128xf32>
    %103 = math.tanh %102 : vector<8x128xf32>
    %c15_i32 = arith.constant 15 : i32
    %104 = arith.index_cast %c15_i32 : i32 to index
    %c0_60 = arith.constant 0 : index
    %c0_61 = arith.constant 0 : index
    %105 = vector.load %arg8[%104, %c0_60, %c0_61] : memref<16x8x128xf32, #tpu.memory_space<vmem>>, vector<1x8x128xf32>
    %106 = vector.shape_cast %105 : vector<1x8x128xf32> to vector<8x128xf32>
    %cst_62 = arith.constant dense<0.000000e+00> : vector<8x128xf32>
    %107 = tpu.matmul %103, %12, %cst_62 {dimension_numbers = #tpu.dot_dimension_numbers<[1], [0], [0], [1], [0, 0, 1, 1], [], []>} : vector<8x128xf32>, vector<128x128xf32>, vector<8x128xf32> -> vector<8x128xf32>
    %108 = arith.addf %106, %107 : vector<8x128xf32>
    %109 = math.tanh %108 : vector<8x128xf32>
    %c16_i32 = arith.constant 16 : i32
    %c0_63 = arith.constant 0 : index
    %c0_64 = arith.constant 0 : index
    %110 = vector.load %arg7[%c0_63, %c0_64] : memref<8x128xf32, #tpu.memory_space<vmem>>, vector<8x128xf32>
    tpu.vector_store %arg7[%c0_63, %c0_64], %109 {strides = array<i32>} : memref<8x128xf32, #tpu.memory_space<vmem>>, vector<8x128xf32>,
    %c1_i32_65 = arith.constant 1 : i32
    %111 = arith.cmpi eq, %arg1, %c1_i32_65 : i32
    %112 = arith.extui %111 : i1 to i32
    %c0_i32_66 = arith.constant 0 : i32
    %113 = arith.cmpi ne, %112, %c0_i32_66 : i32
    scf.if %113 {
      %c0_67 = arith.constant 0 : index
      %c0_68 = arith.constant 0 : index
      %114 = vector.load %arg6[%c0_67, %c0_68] : memref<8x128xf32, #tpu.memory_space<vmem>>, vector<8x128xf32>
      tpu.vector_store %arg6[%c0_67, %c0_68], %109 {strides = array<i32>} : memref<8x128xf32, #tpu.memory_space<vmem>>, vector<8x128xf32>,
    } else {
    }
    return
  }
  func.func @transform_0(%arg0: i32, %arg1: i32) -> (i32, i32, i32) {
    %c0_i32 = arith.constant 0 : i32
    %c0_i32_0 = arith.constant 0 : i32
    return %arg1, %arg0, %c0_i32 : i32, i32, i32
  }
  func.func @transform_1(%arg0: i32, %arg1: i32) -> (i32, i32) {
    %c0_i32 = arith.constant 0 : i32
    %c0_i32_0 = arith.constant 0 : i32
    %c0_i32_1 = arith.constant 0 : i32
    return %c0_i32, %c0_i32_0 : i32, i32
  }
  func.func @transform_2(%arg0: i32, %arg1: i32) -> (i32, i32) {
    %c0_i32 = arith.constant 0 : i32
    %c0_i32_0 = arith.constant 0 : i32
    %c0_i32_1 = arith.constant 0 : i32
    return %c0_i32, %c0_i32_0 : i32, i32
  }
  func.func @transform_3(%arg0: i32, %arg1: i32) -> (i32, i32) {
    %c0_i32 = arith.constant 0 : i32
    %c0_i32_0 = arith.constant 0 : i32
    %c0_i32_1 = arith.constant 0 : i32
    return %c0_i32, %c0_i32_0 : i32, i32
  }
  func.func @transform_4(%arg0: i32, %arg1: i32) -> (i32, i32) {
    %c0_i32 = arith.constant 0 : i32
    %c0_i32_0 = arith.constant 0 : i32
    return %arg0, %c0_i32 : i32, i32
  }
}

</mosaic_0001>

<bundles_post_ra>
// kernel: tpu_custom_call.1
= control target key start
LH: loop header
LB: loop body
LE: loop exit
PB: predicated region body
PF: predicated region fallthrough
CT: control target
= control target key end

     0   :  { %9 = vsyncpa [#allocation5], 0  ;;  %s3876_s0 = inlined_call_operand.hbm [shape: f32[32,8,128], index: 0, kind: input, shape index: {}]   ;;  %s3877_s1 = inlined_call_operand.hbm [shape: f32[128,128], index: 1, kind: input, shape index: {}]   ;;  %s3878_s2 = inlined_call_operand.hbm [shape: f32[128,128], index: 2, kind: input, shape index: {}]   ;;  %s3879_s3 = inlined_call_operand.vmem [shape: f32[1,128], index: 3, kind: input, shape index: {}]   ;;  %s3880_s4 = inlined_call_operand.hbm [shape: f32[8,128], index: 4, kind: output, shape index: {}]  }
   0x1   :  { %11 = vsyncpa [#allocation5 + $0x1], 0 }
   0x2   :  { %12 = vsyncpa [#allocation8], 0 }
   0x3   :  { %13 = vsyncpa [#allocation6], 0  ;;  %s3031_s15 = smov 0   ;;  %s3033_s16 = smov 0  }
   0x4   :  { %s3035_s17 = smov 0   ;;  %s3037_s18 = smov 0  }
   0x5   :  { %s3039_s19 = smov 0   ;;  %s3041_s20 = smov 0  }
   0x6 LB: > { %s1756_s21 = sadd.s32 4294967295, %s2995_s20   ;;  %p53_p0 = scmp.ne.s32.totalorder %s2979_s16, %s2975_s15  ;;  %s2995_s20 = sphi %s3041_s20, %s19_s20   ;;  %s2991_s19 = sphi %s3039_s19, %s3891_s19   ;;  %s2987_s18 = sphi %s3037_s18, %s3890_s18   ;;  %s2983_s17 = sphi %s3035_s17, %s3889_s17   ;;  %s2979_s16 = sphi %s3033_s16, %s3888_s16   ;;  %s2975_s15 = sphi %s3031_s15, %s3887_s15  }
   0x7   : > { %p3063_p1 = scmp.eq.s32.totalorder %s1756_s21, 0  ;;  %p1757_p2 = scmp.ge.s32.totalorder %s2995_s20, 1 }
   0x8   : > { %p153_p3 = scmp.lt.s32.totalorder %s2995_s20, 3  ;;  %s2997_s25 = smov [#allocation7]  }
   0x9   : > { %p3071_p4 = por %p3063_p1, %p53_p0  ;;  %s165_s26 = sshll.u32 %s2997_s25, 4  ;;  %s166_s26 = int_to_ptr.vmem [resolvable:$true] %s165_s26 }
   0xa   : > { %p3075_p5 = pnand %p1757_p2, %p153_p3  ;;  %s2998_s28 = smov [#allocation9]  }
   0xb   : > { %s178_s29 = sshll.u32 %s2998_s28, 4  ;;  %s2844_s30 = scalar_lea.vmem %s166_s26, 2048  ;;  %s179_s29 = int_to_ptr.vmem [resolvable:$true] %s178_s29 }
   0xc   : > { %p2710_p6 = pneg %p3075_p5  ;;  %p2845_p9 = scmp.ne.s32.totalorder %s166_s26, %s2844_s30 }
   0xd   : > { %p2852_p12 = scmp.lt.s32.totalorder %s166_s26, %s166_s26  ;;  %p2853_p13 = scmp.lt.s32.totalorder %s2844_s30, %s2844_s30 }
   0xe   : > { %p3083_p7 = pnand %p2710_p6, %p3063_p1 }
   0xf   : > { %p2854_p0 = por %p2853_p13, %p2852_p12 }
  0x10   : > { %p2835_p8 = pneg %p3083_p7 }
  0x12   : > { %p2847_p10 = pnand %p2845_p9, %p2835_p8 }
  0x14   : > { %p2848_p11 = pneg %p2847_p10 }
  0x16   : > { %p2855_p2 = pnand %p2854_p0, %p2848_p11 }
  0x18   : > { %2858 = shalt.err (!%p2855_p2)
}
  0x19   : > { %s2999_s5 = smov 128   ;;  %s3000_s6 = smov 8  }
  0x1a   : > { %2713 = dma.hbm_to_vmem [thread:$0]  (!%p3083_p7), %s3877_s1, 2048, %s166_s26, [#allocation8], %s2999_s5, %s2999_s5, %s3000_s6  }
  0x1b   : > { %s2870_s9 = scalar_lea.vmem %s179_s29, 2048  ;;  %p2878_p10 = scmp.lt.s32.totalorder %s179_s29, %s179_s29 }
  0x1c   : > { %p2871_p3 = scmp.ne.s32.totalorder %s179_s29, %s2870_s9  ;;  %p2879_p11 = scmp.lt.s32.totalorder %s2870_s9, %s2870_s9 }
  0x1e   : > { %p2873_p6 = pnand %p2871_p3, %p2835_p8  ;;  %p2880_p12 = por %p2879_p11, %p2878_p10 }
  0x20   : > { %p2874_p9 = pneg %p2873_p6 }
  0x22   : > { %p2881_p13 = pnand %p2880_p12, %p2874_p9 }
  0x24   : > { %2884 = shalt.err (!%p2881_p13)
}
  0x25   : > { %2716 = dma.hbm_to_vmem [thread:$0]  (!%p3083_p7), %s3878_s2, 2048, %s179_s29, [#allocation8], %s2999_s5, %s2999_s5, %s3000_s6  }
  0x26   : > { %s28_s12 = sadd.s32 1, %s2991_s19  ;;  %s40_s13 = sadd.s32 1, %s2983_s17 }
  0x27   : > { %p29_p8 = scmp.ge.s32.totalorder %s28_s12, 2  ;;  %p47_p0 = scmp.ne.s32.totalorder %s2983_s17, %s2979_s16 }
  0x28   : > { %p48_p2 = scmp.eq.s32.totalorder %s2995_s20, 0  ;;  %p2723_p3 = scmp.lt.s32.totalorder %s2995_s20, 2 }
  0x29   : > { %s3893_s12 = smov (%p29_p8, %s28_s12), 0  ;;  %s195_s14 = sand.u32 1, %s2983_s17  }
  0x2a   : > { %p49_p6 = por %p48_p2, %p47_p0  ;;  %s35_s15 = ssub.s32 %s2991_s19, %s3893_s12 }
  0x2b   : > { %p38_p9 = scmp.eq.s32.totalorder %s35_s15, 0  ;;  %s1761_s25 = sshll.u32 %s195_s14, 7 }
  0x2c   : > { %s1775_s26 = sshll.u32 %s2991_s19, 11  ;;  %s199_s7 = scalar_lea.vmem [#allocation4], %s1761_s25 }
  0x2d   : > { %s3124_s27 = scalar_select %p38_p9, %s2983_s17, %s40_s13  }
  0x2e   : > { %s206_s30 = scalar_lea.hbm %s3876_s0, %s1775_s26  ;;  %s207_s8 = sshll.u32 %s199_s7, 4  ;;  %s208_s8 = int_to_ptr.vmem [resolvable:$true] %s207_s8 }
  0x2f   : > { %p3131_p7 = pnand %p2723_p3, %p49_p6  ;;  %s196_s10 = scalar_lea.sflag [#allocation5], %s195_s14 }
  0x30   : > { %s2898_s11 = scalar_lea.vmem %s208_s8, 2048  ;;  %s3001_s13 = smov [#allocation4]  }
  0x31   : > { %p2887_p10 = pneg %p3131_p7  ;;  %p2899_p11 = scmp.ne.s32.totalorder %s208_s8, %s2898_s11 }
  0x32   : > { %s2903_s15 = sshll.u32 %s3001_s13, 4  ;;  %s2904_s15 = int_to_ptr.vmem [resolvable:$false] %s2903_s15 }
  0x33   : > { %p2901_p12 = pnand %p2899_p11, %p2887_p10  ;;  %s2905_s26 = scalar_lea.vmem %s2904_s15, 4096 }
  0x34   : > { %p2906_p8 = scmp.lt.s32.totalorder %s208_s8, %s2904_s15  ;;  %p2907_p0 = scmp.lt.s32.totalorder %s2905_s26, %s2898_s11 }
  0x35   : > { %p2902_p13 = pneg %p2901_p12 }
  0x36   : > { %p2908_p2 = por %p2907_p0, %p2906_p8 }
  0x38   : > { %p2909_p9 = pnand %p2908_p2, %p2902_p13 }
  0x3a   : > { %2912 = shalt.err (!%p2909_p9)
}
  0x3b   : > { %2720 = dma.hbm_to_vmem [thread:$0]  (!%p3131_p7), %s206_s30, 2048, %s208_s8, %s196_s10, %s2999_s5, %s2999_s5, %s3000_s6  }
  0x3c   : > { %219 = sbr.rel (%p3075_p5) target bundleno = 3475 (0xd93), region = 36  ;;  %s221_s14 = sand.u32 (!%p3075_p5), 1, %s2979_s16  }
  0x3d   : > { %s1765_s25 = sshll.u32 (!%p3075_p5), %s221_s14, 7  ;;  %s222_s28 = scalar_lea.sflag (!%p3075_p5), [#allocation5], %s221_s14 }
  0x3e   : > { %s3145_s29 = scalar_lea.vmem (!%p3075_p5), [#allocation4], %s1765_s25 }
  0x41   : > { %2962 = dma.done.wait (%p3071_p4), %s222_s28, 2048  }
  0x42   : > { %2964 = vsyncadd (%p3071_p4), %s222_s28, 4294965248 }
  0x43   : > { %2966 = dma.done.wait (%p3063_p1), [#allocation8], 4096  }
  0x44   : > { %2968 = vsyncadd (%p3063_p1), [#allocation8], 4294963200  ;;  %p1768_p5 = scmp.ne.s32.totalorder %s2987_s18, 0 }
  0x46   : > { %257 = sbr.rel (%p1768_p5) target bundleno = 77 (0x4d), region = 52 }
  0x4b   : > { %v3002_v0 = vmov 0.0  }
  0x4c   : > { %258 = vst [vmem:[#allocation2] sm:$0xff] %v3002_v0 }
  0x4d PF: > { %v290_v1 = vld [vmem:[#allocation7 + $0x78] sm:$0xff]  ;;  %v289_v2 = vld [vmem:[#allocation7 + $0x70] sm:$0xff]  ;;  %v3003_v4 = vmov 0.0   ;;  %v288_v6 = vld [vmem:[#allocation7 + $0x68] sm:$0xff]  ;;  %vm3004_vm0 = vmmov 0   ;;  %p1770_p1 = scmp.ne.s32.totalorder %s2987_s18, 1 }
  0x4e   : > { %v3156_v3 = vld [vmem:[#allocation9 + $0x78] sm:$0xff]  ;;  %2080 = vmatprep.subr.mxu0 %v290_v1  ;;  %2136 = vmatprep.subr.mxu1 %v3003_v4  ;;  %v3159_v5 = vld [vmem:[#allocation9 + $0x70] sm:$0xff]  ;;  %v3163_v7 = vld [vmem:[#allocation9 + $0x68] sm:$0xff] }
  0x4f   : > { %2081 = vmatpush3.msra.mxu0 %v290_v1  ;;  %2137 = vmatpush3.msra.mxu1 %v3156_v3  ;;  %v287_v8 = vld [vmem:[#allocation7 + $0x60] sm:$0xff]  ;;  %v286_v10 = vld [vmem:[#allocation7 + $0x58] sm:$0xff]  ;;  %v285_v12 = vld [vmem:[#allocation7 + $0x50] sm:$0xff] }
  0x50   : > { %2082 = vmatprep.subr.mxu0 %v289_v2  ;;  %2138 = vmatprep.subr.mxu1 %v3003_v4  ;;  %v3167_v9 = vld [vmem:[#allocation9 + $0x60] sm:$0xff]  ;;  %v3171_v11 = vld [vmem:[#allocation9 + $0x58] sm:$0xff]  ;;  %v3175_v13 = vld [vmem:[#allocation9 + $0x50] sm:$0xff] }
  0x51   : > { %2083 = vmatpush3.msra.mxu0 %v289_v2  ;;  %2139 = vmatpush3.msra.mxu1 %v3159_v5  ;;  %v284_v14 = vld [vmem:[#allocation7 + $0x48] sm:$0xff]  ;;  %v283_v16 = vld [vmem:[#allocation7 + $0x40] sm:$0xff]  ;;  %v282_v18 = vld [vmem:[#allocation7 + $0x38] sm:$0xff] }
  0x52   : > { %2084 = vmatprep.subr.mxu0 %v288_v6  ;;  %2140 = vmatprep.subr.mxu1 %v3003_v4  ;;  %v3179_v15 = vld [vmem:[#allocation9 + $0x48] sm:$0xff]  ;;  %v3183_v17 = vld [vmem:[#allocation9 + $0x40] sm:$0xff]  ;;  %v3187_v19 = vld [vmem:[#allocation9 + $0x38] sm:$0xff] }
  0x53   : > { %2085 = vmatpush3.msra.mxu0 %v288_v6  ;;  %2141 = vmatpush3.msra.mxu1 %v3163_v7  ;;  %v281_v20 = vld [vmem:[#allocation7 + $0x30] sm:$0xff]  ;;  %v280_v22 = vld [vmem:[#allocation7 + $0x28] sm:$0xff]  ;;  %v279_v24 = vld [vmem:[#allocation7 + $0x20] sm:$0xff] }
  0x54   : > { %2086 = vmatprep.subr.mxu0 %v287_v8  ;;  %2142 = vmatprep.subr.mxu1 %v3003_v4  ;;  %v3191_v21 = vld [vmem:[#allocation9 + $0x30] sm:$0xff]  ;;  %v3195_v23 = vld [vmem:[#allocation9 + $0x28] sm:$0xff]  ;;  %v3199_v25 = vld [vmem:[#allocation9 + $0x20] sm:$0xff] }
  0x55   : > { %2087 = vmatpush3.msra.mxu0 %v287_v8  ;;  %2143 = vmatpush3.msra.mxu1 %v3167_v9  ;;  %v278_v26 = vld [vmem:[#allocation7 + $0x18] sm:$0xff]  ;;  %v277_v28 = vld [vmem:[#allocation7 + $0x10] sm:$0xff]  ;;  %v276_v30 = vld [vmem:[#allocation7 + $0x8] sm:$0xff] }
  0x56   : > { %2088 = vmatprep.subr.mxu0 %v286_v10  ;;  %2144 = vmatprep.subr.mxu1 %v3003_v4  ;;  %v3203_v27 = vld [vmem:[#allocation9 + $0x18] sm:$0xff]  ;;  %v3207_v29 = vld [vmem:[#allocation9 + $0x10] sm:$0xff]  ;;  %v259_v31 = vld [vmem:[%s3145_s29] sm:$0xff] }
  0x57   : > { %2089 = vmatpush3.msra.mxu0 %v286_v10  ;;  %2145 = vmatpush3.msra.mxu1 %v3171_v11  ;;  %v275_v32 = vld [vmem:[#allocation7] sm:$0xff]  ;;  %v3213_v33 = vld [vmem:[#allocation9 + $0x8] sm:$0xff]  ;;  %v475_v36 = vld [vmem:[#allocation2] sm:$0xff] }
  0x58   : > { %2090 = vmatprep.subr.mxu0 %v285_v12  ;;  %2146 = vmatprep.subr.mxu1 %v3003_v4  ;;  %v260_v34 = vld [vmem:[%s3145_s29 + $0x8] sm:$0xff]  ;;  %v3217_v35 = vld [vmem:[#allocation9] sm:$0xff]  ;;  %v261_v37 = vld [vmem:[%s3145_s29 + $0x10] sm:$0xff] }
  0x59   : > { %2091 = vmatpush3.msra.mxu0 %v285_v12  ;;  %2147 = vmatpush3.msra.mxu1 %v3175_v13  ;;  %v262_v38 = vld [vmem:[%s3145_s29 + $0x18] sm:$0xff]  ;;  %v263_v39 = vld [vmem:[%s3145_s29 + $0x20] sm:$0xff]  ;;  %v264_v40 = vld [vmem:[%s3145_s29 + $0x28] sm:$0xff] }
  0x5a   : > { %2092 = vmatprep.subr.mxu0 %v284_v14  ;;  %2148 = vmatprep.subr.mxu1 %v3003_v4  ;;  %v265_v41 = vld [vmem:[%s3145_s29 + $0x30] sm:$0xff]  ;;  %v266_v42 = vld [vmem:[%s3145_s29 + $0x38] sm:$0xff]  ;;  %v267_v43 = vld [vmem:[%s3145_s29 + $0x40] sm:$0xff] }
  0x5b   : > { %2093 = vmatpush3.msra.mxu0 %v284_v14  ;;  %2149 = vmatpush3.msra.mxu1 %v3179_v15  ;;  %v268_v44 = vld [vmem:[%s3145_s29 + $0x48] sm:$0xff]  ;;  %v269_v45 = vld [vmem:[%s3145_s29 + $0x50] sm:$0xff]  ;;  %v270_v46 = vld [vmem:[%s3145_s29 + $0x58] sm:$0xff] }
  0x5c   : > { %2094 = vmatprep.subr.mxu0 %v283_v16  ;;  %2150 = vmatprep.subr.mxu1 %v3003_v4  ;;  %v271_v47 = vld [vmem:[%s3145_s29 + $0x60] sm:$0xff]  ;;  %v272_v48 = vld [vmem:[%s3145_s29 + $0x68] sm:$0xff]  ;;  %v273_v49 = vld [vmem:[%s3145_s29 + $0x70] sm:$0xff] }
  0x5d   : > { %2095 = vmatpush3.msra.mxu0 %v283_v16  ;;  %2151 = vmatpush3.msra.mxu1 %v3183_v17  ;;  %v274_v50 = vld [vmem:[%s3145_s29 + $0x78] sm:$0xff] }
  0x5e   : > { %2096 = vmatprep.subr.mxu0 %v282_v18  ;;  %2152 = vmatprep.subr.mxu1 %v3003_v4  ;;  %v3311_v52 = vld [vmem:[%s3879_s3] ss:$0 sm:$0xff] }
  0x5f   : > { %2097 = vmatpush3.msra.mxu0 %v282_v18  ;;  %2153 = vmatpush3.msra.mxu1 %v3187_v19 }
  0x60   : > { %2098 = vmatprep.subr.mxu0 %v281_v20  ;;  %2154 = vmatprep.subr.mxu1 %v3003_v4 }
  0x61   : > { %2099 = vmatpush3.msra.mxu0 %v281_v20  ;;  %2155 = vmatpush3.msra.mxu1 %v3191_v21 }
  0x62   : > { %2100 = vmatprep.subr.mxu0 %v280_v22  ;;  %2156 = vmatprep.subr.mxu1 %v3003_v4 }
  0x63   : > { %2101 = vmatpush3.msra.mxu0 %v280_v22  ;;  %2157 = vmatpush3.msra.mxu1 %v3195_v23 }
  0x64   : > { %2102 = vmatprep.subr.mxu0 %v279_v24  ;;  %2158 = vmatprep.subr.mxu1 %v3003_v4 }
  0x65   : > { %2103 = vmatpush3.msra.mxu0 %v279_v24  ;;  %2159 = vmatpush3.msra.mxu1 %v3199_v25 }
  0x66   : > { %2104 = vmatprep.subr.mxu0 %v278_v26  ;;  %2160 = vmatprep.subr.mxu1 %v3003_v4 }
  0x67   : > { %2105 = vmatpush3.msra.mxu0 %v278_v26  ;;  %2161 = vmatpush3.msra.mxu1 %v3203_v27 }
  0x68   : > { %2106 = vmatprep.subr.mxu0 %v277_v28  ;;  %2162 = vmatprep.subr.mxu1 %v3003_v4 }
  0x69   : > { %2107 = vmatpush3.msra.mxu0 %v277_v28  ;;  %2163 = vmatpush3.msra.mxu1 %v3207_v29 }
  0x6a   : > { %2108 = vmatprep.subr.mxu0 %v276_v30  ;;  %2164 = vmatprep.subr.mxu1 %v3003_v4 }
  0x6b   : > { %2109 = vmatpush3.msra.mxu0 %v276_v30  ;;  %2112 = vmatprep.mubr.f32.mxu0 %v259_v31 }
  0x6c   : > { %2110 = vmatprep.subr.mxu0 %v275_v32  ;;  %2165 = vmatpush3.msra.mxu1 %v3213_v33 }
  0x6d   : > { %2111 = vmatpush3.msra.mxu0 %v275_v32  ;;  %2166 = vmatprep.subr.mxu1 %v3003_v4 }
  0x6e   : > { %2113 = vmatmul.mubr.f32.vlgmr.msra.gmra.mxu0 %v260_v34  ;;  %2167 = vmatpush3.msra.mxu1 %v3217_v35 }
  0x6f   : > { %2168 = vmatprep.mubr.msk.f32.mxu1 %vm3004_vm0, %v3003_v4  ;;  %2171 = vmatprep.subr.mxu0 %v3003_v4 }
  0x70   : > { %2169 = vmatmul.mubr.f32.vlgmr.msra.gmra.mxu1 %v475_v36  ;;  %2172 = vmatpush3.msra.mxu0 %v3156_v3 }
  0x71   : > { %2115 = vmatprep.mubr.f32.mxu0 %v261_v37  ;;  %2173 = vmatprep.subr.mxu0 %v3003_v4 }
  0x72   : > { %2116 = vmatmul.mubr.f32.gmra.mxu0 %v262_v38  ;;  %2206 = vmatprep.subr.mxu1 %v3003_v4 }
  0x73   : > { %2174 = vmatpush3.msra.mxu0 %v3159_v5  ;;  %2118 = vmatprep.mubr.f32.mxu0 %v263_v39 }
  0x74   : > { %2175 = vmatprep.subr.mxu0 %v3003_v4  ;;  %2207 = vmatpush3.msra.mxu1 %v3156_v3 }
  0x75   : > { %2176 = vmatpush3.msra.mxu0 %v3163_v7  ;;  %2208 = vmatprep.subr.mxu1 %v3003_v4 }
  0x76   : > { %2177 = vmatprep.subr.mxu0 %v3003_v4  ;;  %2119 = vmatmul.mubr.f32.gmra.mxu0 %v264_v40 }
  0x77   : > { %2178 = vmatpush3.msra.mxu0 %v3167_v9  ;;  %2121 = vmatprep.mubr.f32.mxu0 %v265_v41 }
  0x78   : > { %2179 = vmatprep.subr.mxu0 %v3003_v4  ;;  %2209 = vmatpush3.msra.mxu1 %v3159_v5 }
  0x79   : > { %2180 = vmatpush3.msra.mxu0 %v3171_v11  ;;  %2210 = vmatprep.subr.mxu1 %v3003_v4 }
  0x7a   : > { %2181 = vmatprep.subr.mxu0 %v3003_v4  ;;  %2122 = vmatmul.mubr.f32.gmra.mxu0 %v266_v42 }
  0x7b   : > { %2182 = vmatpush3.msra.mxu0 %v3175_v13  ;;  %2211 = vmatpush3.msra.mxu1 %v3163_v7 }
  0x7c   : > { %2183 = vmatprep.subr.mxu0 %v3003_v4  ;;  %2212 = vmatprep.subr.mxu1 %v3003_v4 }
  0x7d   : > { %2184 = vmatpush3.msra.mxu0 %v3179_v15  ;;  %2213 = vmatpush3.msra.mxu1 %v3167_v9 }
  0x7e   : > { %2185 = vmatprep.subr.mxu0 %v3003_v4  ;;  %2214 = vmatprep.subr.mxu1 %v3003_v4 }
  0x7f   : > { %2186 = vmatpush3.msra.mxu0 %v3183_v17  ;;  %2215 = vmatpush3.msra.mxu1 %v3171_v11 }
  0x80   : > { %2187 = vmatprep.subr.mxu0 %v3003_v4  ;;  %2216 = vmatprep.subr.mxu1 %v3003_v4 }
  0x81   : > { %2188 = vmatpush3.msra.mxu0 %v3187_v19  ;;  %2217 = vmatpush3.msra.mxu1 %v3175_v13 }
  0x82   : > { %2189 = vmatprep.subr.mxu0 %v3003_v4  ;;  %2218 = vmatprep.subr.mxu1 %v3003_v4 }
  0x83   : > { %2190 = vmatpush3.msra.mxu0 %v3191_v21  ;;  %2219 = vmatpush3.msra.mxu1 %v3179_v15 }
  0x84   : > { %2191 = vmatprep.subr.mxu0 %v3003_v4  ;;  %2220 = vmatprep.subr.mxu1 %v3003_v4 }
  0x85   : > { %2192 = vmatpush3.msra.mxu0 %v3195_v23  ;;  %2221 = vmatpush3.msra.mxu1 %v3183_v17 }
  0x86   : > { %2193 = vmatprep.subr.mxu0 %v3003_v4  ;;  %2222 = vmatprep.subr.mxu1 %v3003_v4 }
  0x87   : > { %2194 = vmatpush3.msra.mxu0 %v3199_v25  ;;  %2223 = vmatpush3.msra.mxu1 %v3187_v19 }
  0x88   : > { %2195 = vmatprep.subr.mxu0 %v3003_v4  ;;  %2224 = vmatprep.subr.mxu1 %v3003_v4 }
  0x89   : > { %2196 = vmatpush3.msra.mxu0 %v3203_v27  ;;  %2225 = vmatpush3.msra.mxu1 %v3191_v21 }
  0x8a   : > { %2197 = vmatprep.subr.mxu0 %v3003_v4  ;;  %2226 = vmatprep.subr.mxu1 %v3003_v4 }
  0x8b   : > { %2198 = vmatpush3.msra.mxu0 %v3207_v29  ;;  %2227 = vmatpush3.msra.mxu1 %v3195_v23 }
  0x8c   : > { %2199 = vmatprep.subr.mxu0 %v3003_v4  ;;  %2228 = vmatprep.subr.mxu1 %v3003_v4 }
  0x8d   : > { %2200 = vmatpush3.msra.mxu0 %v3213_v33  ;;  %2229 = vmatpush3.msra.mxu1 %v3199_v25 }
  0x8e   : > { %2201 = vmatprep.subr.mxu0 %v3003_v4  ;;  %2230 = vmatprep.subr.mxu1 %v3003_v4 }
  0x8f   : > { %2202 = vmatpush3.msra.mxu0 %v3217_v35  ;;  %2231 = vmatpush3.msra.mxu1 %v3203_v27 }
  0x90   : > { %2232 = vmatprep.subr.mxu1 %v3003_v4  ;;  %2238 = vmatprep.mubr.msk.f32.mxu1 %vm3004_vm0, %v3003_v4 }
  0x91   : > { %2233 = vmatpush3.msra.mxu1 %v3207_v29  ;;  %2241 = vmatprep.subr.mxu0 %v3003_v4 }
  0x92   : > { %2234 = vmatprep.subr.mxu1 %v3003_v4  ;;  %2124 = vmatprep.mubr.f32.mxu0 %v267_v43 }
  0x93   : > { %2235 = vmatpush3.msra.mxu1 %v3213_v33  ;;  %2125 = vmatmul.mubr.f32.gmra.mxu0 %v268_v44 }
  0x94   : > { %2236 = vmatprep.subr.mxu1 %v3003_v4  ;;  %2127 = vmatprep.mubr.f32.mxu0 %v269_v45 }
  0x95   : > { %2237 = vmatpush3.msra.mxu1 %v3217_v35 }
  0x96   : > { %2276 = vmatprep.subr.mxu1 %v3003_v4 }
  0x97   : > { %2128 = vmatmul.mubr.f32.gmra.mxu0 %v270_v46 }
  0x98   : > { %2130 = vmatprep.mubr.f32.mxu0 %v271_v47 }
  0x9b   : > { %2131 = vmatmul.mubr.f32.gmra.mxu0 %v272_v48 }
  0x9c   : > { %2133 = vmatprep.mubr.f32.mxu0 %v273_v49 }
  0x9f   : > { %2134 = vmatmul.mubr.f32.gmra.mxu0 %v274_v50 }
  0xa0   : > { %2203 = vmatprep.mubr.msk.f32.mxu0 %vm3004_vm0, %v3003_v4 }
 0x12e   : > { %v2114_v51 = vpop.f32.mrf.mxu0 }
 0x12f   : > { %v370_v18 = vadd.f32 %v2114_v51, %v3311_v52 }
 0x130   : > { %v364_v53 = vpop.f32.mrf.mxu0  ;;  %v543_v54 = vpop.f32.mrf.mxu1 }
 0x131   : > { %v365_v55 = vadd.f32 %v3311_v52, %v364_v53 }
 0x132   : > { %v2170_v56 = vpop.f32.mrf.mxu1  ;;  %v3348_v59 = vpop.f32.mrf.mxu0 }
 0x133   : > { %v547_v57 = vadd.f32 %v543_v54, %v365_v55  ;;  %v380_v36 = vadd.f32 %v3348_v59, %v3311_v52 }
 0x134   : > { %v374_v60 = vpop.f32.mrf.mxu0 }
 0x135   : > { %2784 = vtanh.f32 %v547_v57  ;;  %v375_v28 = vadd.f32 %v3311_v52, %v374_v60 }
 0x136   : > { %v3350_v61 = vpop.f32.mrf.mxu0 }
 0x137   : > { %v390_v46 = vadd.f32 %v3350_v61, %v3311_v52 }
 0x138   : > { %v3352_v62 = vpop.f32.mrf.mxu0 }
 0x139   : > { %v385_v41 = vadd.f32 %v3311_v52, %v3352_v62  ;;  %v3644_v62 = vld [vmem:[#allocation9 + $0x58] sm:$0xff] }
 0x13a   : > { %v3354_v63 = vpop.f32.mrf.mxu0 }
 0x13b   : > { %v400_v57 = vadd.f32 %v3354_v63, %v3311_v52  ;;  %v3648_v63 = vld [vmem:[#allocation9 + $0x50] sm:$0xff] }
 0x13c   : > { %v3356_v0 = vpop.f32.mrf.mxu0 }
 0x13d   : > { %v395_v51 = vadd.f32 %v3311_v52, %v3356_v0  ;;  %v3652_v0 = vld [vmem:[#allocation9 + $0x48] sm:$0xff] }
 0x142   : > { %v2785_v58 = vpop.eup %2784 }
 0x143   : > { %2204 = vmatmul.mubr.f32.vlgmr.msra.gmra.mxu0 %v2785_v58 }
 0x144   : > { %2242 = vmatpush3.msra.mxu0 %v3156_v3  ;;  %2273 = vmatprep.mubr.msk.f32.mxu0 %vm3004_vm0, %v3003_v4 }
 0x145   : > { %2243 = vmatprep.subr.mxu0 %v3003_v4 }
 0x146   : > { %2244 = vmatpush3.msra.mxu0 %v3159_v5 }
 0x147   : > { %2245 = vmatprep.subr.mxu0 %v3003_v4 }
 0x148   : > { %2246 = vmatpush3.msra.mxu0 %v3163_v7 }
 0x149   : > { %2247 = vmatprep.subr.mxu0 %v3003_v4 }
 0x14a   : > { %2248 = vmatpush3.msra.mxu0 %v3167_v9 }
 0x14b   : > { %2249 = vmatprep.subr.mxu0 %v3003_v4 }
 0x14c   : > { %2250 = vmatpush3.msra.mxu0 %v3171_v11 }
 0x14d   : > { %2251 = vmatprep.subr.mxu0 %v3003_v4 }
 0x14e   : > { %2252 = vmatpush3.msra.mxu0 %v3175_v13 }
 0x14f   : > { %2253 = vmatprep.subr.mxu0 %v3003_v4 }
 0x150   : > { %2254 = vmatpush3.msra.mxu0 %v3179_v15 }
 0x151   : > { %2255 = vmatprep.subr.mxu0 %v3003_v4 }
 0x152   : > { %2256 = vmatpush3.msra.mxu0 %v3183_v17 }
 0x153   : > { %2257 = vmatprep.subr.mxu0 %v3003_v4  ;;  %v3358_v1 = vpop.f32.mrf.mxu0 }
 0x154   : > { %2258 = vmatpush3.msra.mxu0 %v3187_v19 }
 0x155   : > { %2259 = vmatprep.subr.mxu0 %v3003_v4  ;;  %v3360_v2 = vpop.f32.mrf.mxu0 }
 0x156   : > { %2260 = vmatpush3.msra.mxu0 %v3191_v21 }
 0x157   : > { %2261 = vmatprep.subr.mxu0 %v3003_v4  ;;  %v3362_v6 = vpop.f32.mrf.mxu0 }
 0x158   : > { %2262 = vmatpush3.msra.mxu0 %v3195_v23 }
 0x159   : > { %2263 = vmatprep.subr.mxu0 %v3003_v4  ;;  %v3364_v8 = vpop.f32.mrf.mxu0 }
 0x15a   : > { %2264 = vmatpush3.msra.mxu0 %v3199_v25 }
 0x15b   : > { %2265 = vmatprep.subr.mxu0 %v3003_v4  ;;  %v3366_v10 = vpop.f32.mrf.mxu0 }
 0x15c   : > { %2266 = vmatpush3.msra.mxu0 %v3203_v27 }
 0x15d   : > { %2267 = vmatprep.subr.mxu0 %v3003_v4  ;;  %v3368_v12 = vpop.f32.mrf.mxu0 }
 0x15e   : > { %2268 = vmatpush3.msra.mxu0 %v3207_v29 }
 0x15f   : > { %2269 = vmatprep.subr.mxu0 %v3003_v4  ;;  %v3370_v14 = vpop.f32.mrf.mxu0 }
 0x160   : > { %2270 = vmatpush3.msra.mxu0 %v3213_v33 }
 0x161   : > { %2271 = vmatprep.subr.mxu0 %v3003_v4  ;;  %v3372_v16 = vpop.f32.mrf.mxu0 }
 0x162   : > { %2272 = vmatpush3.msra.mxu0 %v3217_v35 }
 0x163   : > { %2311 = vmatprep.subr.mxu0 %v3003_v4 }
 0x203   : > { %v617_v20 = vpop.f32.mrf.mxu0 }
 0x204   : > { %v621_v22 = vadd.f32 %v617_v20, %v370_v18  ;;  %v3660_v18 = vld [vmem:[#allocation9 + $0x38] sm:$0xff] }
 0x205   : > { %v2205_v24 = vpop.f32.mrf.mxu0 }
 0x206   : > { %2786 = vtanh.f32 %v621_v22  ;;  %v3716_v22 = vld [vmem:[#allocation9 + $0x10] sm:$0xff]  ;;  %v3720_v24 = vld [vmem:[#allocation9 + $0x8] sm:$0xff] }
 0x213   : > { %v2787_v26 = vpop.eup %2786 }
 0x214   : > { %2239 = vmatmul.mubr.f32.vlgmr.msra.gmra.mxu1 %v2787_v26  ;;  %v3724_v26 = vld [vmem:[#allocation9] sm:$0xff] }
 0x215   : > { %2277 = vmatpush3.msra.mxu1 %v3156_v3  ;;  %2308 = vmatprep.mubr.msk.f32.mxu1 %vm3004_vm0, %v3003_v4 }
 0x216   : > { %2278 = vmatprep.subr.mxu1 %v3003_v4 }
 0x217   : > { %2279 = vmatpush3.msra.mxu1 %v3159_v5 }
 0x218   : > { %2280 = vmatprep.subr.mxu1 %v3003_v4 }
 0x219   : > { %2281 = vmatpush3.msra.mxu1 %v3163_v7 }
 0x21a   : > { %2282 = vmatprep.subr.mxu1 %v3003_v4 }
 0x21b   : > { %2283 = vmatpush3.msra.mxu1 %v3167_v9 }
 0x21c   : > { %2284 = vmatprep.subr.mxu1 %v3003_v4 }
 0x21d   : > { %2285 = vmatpush3.msra.mxu1 %v3171_v11 }
 0x21e   : > { %2286 = vmatprep.subr.mxu1 %v3003_v4 }
 0x21f   : > { %2287 = vmatpush3.msra.mxu1 %v3175_v13 }
 0x220   : > { %2288 = vmatprep.subr.mxu1 %v3003_v4 }
 0x221   : > { %2289 = vmatpush3.msra.mxu1 %v3179_v15 }
 0x222   : > { %2290 = vmatprep.subr.mxu1 %v3003_v4 }
 0x223   : > { %2291 = vmatpush3.msra.mxu1 %v3183_v17 }
 0x224   : > { %2292 = vmatprep.subr.mxu1 %v3003_v4 }
 0x225   : > { %2293 = vmatpush3.msra.mxu1 %v3187_v19 }
 0x226   : > { %2294 = vmatprep.subr.mxu1 %v3003_v4 }
 0x227   : > { %2295 = vmatpush3.msra.mxu1 %v3191_v21 }
 0x228   : > { %2296 = vmatprep.subr.mxu1 %v3003_v4 }
 0x229   : > { %2297 = vmatpush3.msra.mxu1 %v3195_v23 }
 0x22a   : > { %2298 = vmatprep.subr.mxu1 %v3003_v4 }
 0x22b   : > { %2299 = vmatpush3.msra.mxu1 %v3199_v25 }
 0x22c   : > { %2300 = vmatprep.subr.mxu1 %v3003_v4 }
 0x22d   : > { %2301 = vmatpush3.msra.mxu1 %v3203_v27 }
 0x22e   : > { %2302 = vmatprep.subr.mxu1 %v3003_v4 }
 0x22f   : > { %2303 = vmatpush3.msra.mxu1 %v3207_v29 }
 0x230   : > { %2304 = vmatprep.subr.mxu1 %v3003_v4 }
 0x231   : > { %2305 = vmatpush3.msra.mxu1 %v3213_v33 }
 0x232   : > { %2306 = vmatprep.subr.mxu1 %v3003_v4 }
 0x233   : > { %2307 = vmatpush3.msra.mxu1 %v3217_v35 }
 0x234   : > { %2346 = vmatprep.subr.mxu1 %v3003_v4 }
 0x2d4   : > { %v691_v30 = vpop.f32.mrf.mxu1 }
 0x2d5   : > { %v695_v31 = vadd.f32 %v691_v30, %v375_v28  ;;  %v415_v28 = vadd.f32 %v3311_v52, %v3364_v8  ;;  %v420_v8 = vadd.f32 %v3362_v6, %v3311_v52  ;;  %v425_v6 = vadd.f32 %v3311_v52, %v3368_v12 }
 0x2d6   : > { %v2240_v32 = vpop.f32.mrf.mxu1 }
 0x2d7   : > { %2788 = vtanh.f32 %v695_v31 }
 0x2e4   : > { %v2789_v34 = vpop.eup %2788 }
 0x2e5   : > { %2274 = vmatmul.mubr.f32.vlgmr.msra.gmra.mxu0 %v2789_v34 }
 0x2e6   : > { %2312 = vmatpush3.msra.mxu0 %v3156_v3  ;;  %2343 = vmatprep.mubr.msk.f32.mxu0 %vm3004_vm0, %v3003_v4 }
 0x2e7   : > { %2313 = vmatprep.subr.mxu0 %v3003_v4 }
 0x2e8   : > { %2314 = vmatpush3.msra.mxu0 %v3159_v5 }
 0x2e9   : > { %2315 = vmatprep.subr.mxu0 %v3003_v4 }
 0x2ea   : > { %2316 = vmatpush3.msra.mxu0 %v3163_v7 }
 0x2eb   : > { %2317 = vmatprep.subr.mxu0 %v3003_v4 }
 0x2ec   : > { %2318 = vmatpush3.msra.mxu0 %v3167_v9 }
 0x2ed   : > { %2319 = vmatprep.subr.mxu0 %v3003_v4 }
 0x2ee   : > { %2320 = vmatpush3.msra.mxu0 %v3171_v11 }
 0x2ef   : > { %2321 = vmatprep.subr.mxu0 %v3003_v4 }
 0x2f0   : > { %2322 = vmatpush3.msra.mxu0 %v3175_v13 }
 0x2f1   : > { %2323 = vmatprep.subr.mxu0 %v3003_v4 }
 0x2f2   : > { %2324 = vmatpush3.msra.mxu0 %v3179_v15 }
 0x2f3   : > { %2325 = vmatprep.subr.mxu0 %v3003_v4 }
 0x2f4   : > { %2326 = vmatpush3.msra.mxu0 %v3183_v17 }
 0x2f5   : > { %2327 = vmatprep.subr.mxu0 %v3003_v4 }
 0x2f6   : > { %2328 = vmatpush3.msra.mxu0 %v3187_v19 }
 0x2f7   : > { %2329 = vmatprep.subr.mxu0 %v3003_v4 }
 0x2f8   : > { %2330 = vmatpush3.msra.mxu0 %v3191_v21 }
 0x2f9   : > { %2331 = vmatprep.subr.mxu0 %v3003_v4 }
 0x2fa   : > { %2332 = vmatpush3.msra.mxu0 %v3195_v23 }
 0x2fb   : > { %2333 = vmatprep.subr.mxu0 %v3003_v4 }
 0x2fc   : > { %2334 = vmatpush3.msra.mxu0 %v3199_v25 }
 0x2fd   : > { %2335 = vmatprep.subr.mxu0 %v3003_v4 }
 0x2fe   : > { %2336 = vmatpush3.msra.mxu0 %v3203_v27 }
 0x2ff   : > { %2337 = vmatprep.subr.mxu0 %v3003_v4 }
 0x300   : > { %2338 = vmatpush3.msra.mxu0 %v3207_v29 }
 0x301   : > { %2339 = vmatprep.subr.mxu0 %v3003_v4 }
 0x302   : > { %2340 = vmatpush3.msra.mxu0 %v3213_v33 }
 0x303   : > { %2341 = vmatprep.subr.mxu0 %v3003_v4 }
 0x304   : > { %2342 = vmatpush3.msra.mxu0 %v3217_v35 }
 0x305   : > { %2381 = vmatprep.subr.mxu0 %v3003_v4 }
 0x3a5   : > { %v765_v37 = vpop.f32.mrf.mxu0 }
 0x3a6   : > { %v769_v38 = vadd.f32 %v765_v37, %v380_v36 }
 0x3a7   : > { %v2275_v39 = vpop.f32.mrf.mxu0 }
 0x3a8   : > { %2790 = vtanh.f32 %v769_v38 }
 0x3b5   : > { %v2791_v40 = vpop.eup %2790 }
 0x3b6   : > { %2309 = vmatmul.mubr.f32.vlgmr.msra.gmra.mxu1 %v2791_v40 }
 0x3b7   : > { %2347 = vmatpush3.msra.mxu1 %v3156_v3  ;;  %2378 = vmatprep.mubr.msk.f32.mxu1 %vm3004_vm0, %v3003_v4 }
 0x3b8   : > { %2348 = vmatprep.subr.mxu1 %v3003_v4 }
 0x3b9   : > { %2349 = vmatpush3.msra.mxu1 %v3159_v5 }
 0x3ba   : > { %2350 = vmatprep.subr.mxu1 %v3003_v4 }
 0x3bb   : > { %2351 = vmatpush3.msra.mxu1 %v3163_v7 }
 0x3bc   : > { %2352 = vmatprep.subr.mxu1 %v3003_v4 }
 0x3bd   : > { %2353 = vmatpush3.msra.mxu1 %v3167_v9 }
 0x3be   : > { %2354 = vmatprep.subr.mxu1 %v3003_v4 }
 0x3bf   : > { %2355 = vmatpush3.msra.mxu1 %v3171_v11 }
 0x3c0   : > { %2356 = vmatprep.subr.mxu1 %v3003_v4 }
 0x3c1   : > { %2357 = vmatpush3.msra.mxu1 %v3175_v13 }
 0x3c2   : > { %2358 = vmatprep.subr.mxu1 %v3003_v4 }
 0x3c3   : > { %2359 = vmatpush3.msra.mxu1 %v3179_v15 }
 0x3c4   : > { %2360 = vmatprep.subr.mxu1 %v3003_v4 }
 0x3c5   : > { %2361 = vmatpush3.msra.mxu1 %v3183_v17 }
 0x3c6   : > { %2362 = vmatprep.subr.mxu1 %v3003_v4 }
 0x3c7   : > { %2363 = vmatpush3.msra.mxu1 %v3187_v19 }
 0x3c8   : > { %2364 = vmatprep.subr.mxu1 %v3003_v4 }
 0x3c9   : > { %2365 = vmatpush3.msra.mxu1 %v3191_v21 }
 0x3ca   : > { %2366 = vmatprep.subr.mxu1 %v3003_v4 }
 0x3cb   : > { %2367 = vmatpush3.msra.mxu1 %v3195_v23 }
 0x3cc   : > { %2368 = vmatprep.subr.mxu1 %v3003_v4 }
 0x3cd   : > { %2369 = vmatpush3.msra.mxu1 %v3199_v25 }
 0x3ce   : > { %2370 = vmatprep.subr.mxu1 %v3003_v4 }
 0x3cf   : > { %2371 = vmatpush3.msra.mxu1 %v3203_v27 }
 0x3d0   : > { %2372 = vmatprep.subr.mxu1 %v3003_v4 }
 0x3d1   : > { %2373 = vmatpush3.msra.mxu1 %v3207_v29 }
 0x3d2   : > { %2374 = vmatprep.subr.mxu1 %v3003_v4 }
 0x3d3   : > { %2375 = vmatpush3.msra.mxu1 %v3213_v33 }
 0x3d4   : > { %2376 = vmatprep.subr.mxu1 %v3003_v4 }
 0x3d5   : > { %2377 = vmatpush3.msra.mxu1 %v3217_v35 }
 0x3d6   : > { %2416 = vmatprep.subr.mxu1 %v3003_v4 }
 0x476   : > { %v839_v42 = vpop.f32.mrf.mxu1 }
 0x477   : > { %v843_v43 = vadd.f32 %v839_v42, %v385_v41 }
 0x478   : > { %v2310_v44 = vpop.f32.mrf.mxu1 }
 0x479   : > { %2792 = vtanh.f32 %v843_v43 }
 0x486   : > { %v2793_v45 = vpop.eup %2792 }
 0x487   : > { %2344 = vmatmul.mubr.f32.vlgmr.msra.gmra.mxu0 %v2793_v45 }
 0x488   : > { %2382 = vmatpush3.msra.mxu0 %v3156_v3  ;;  %2413 = vmatprep.mubr.msk.f32.mxu0 %vm3004_vm0, %v3003_v4 }
 0x489   : > { %2383 = vmatprep.subr.mxu0 %v3003_v4 }
 0x48a   : > { %2384 = vmatpush3.msra.mxu0 %v3159_v5 }
 0x48b   : > { %2385 = vmatprep.subr.mxu0 %v3003_v4 }
 0x48c   : > { %2386 = vmatpush3.msra.mxu0 %v3163_v7 }
 0x48d   : > { %2387 = vmatprep.subr.mxu0 %v3003_v4 }
 0x48e   : > { %2388 = vmatpush3.msra.mxu0 %v3167_v9 }
 0x48f   : > { %2389 = vmatprep.subr.mxu0 %v3003_v4 }
 0x490   : > { %2390 = vmatpush3.msra.mxu0 %v3171_v11 }
 0x491   : > { %2391 = vmatprep.subr.mxu0 %v3003_v4 }
 0x492   : > { %2392 = vmatpush3.msra.mxu0 %v3175_v13 }
 0x493   : > { %2393 = vmatprep.subr.mxu0 %v3003_v4 }
 0x494   : > { %2394 = vmatpush3.msra.mxu0 %v3179_v15 }
 0x495   : > { %2395 = vmatprep.subr.mxu0 %v3003_v4 }
 0x496   : > { %2396 = vmatpush3.msra.mxu0 %v3183_v17 }
 0x497   : > { %2397 = vmatprep.subr.mxu0 %v3003_v4 }
 0x498   : > { %2398 = vmatpush3.msra.mxu0 %v3187_v19 }
 0x499   : > { %2399 = vmatprep.subr.mxu0 %v3003_v4 }
 0x49a   : > { %2400 = vmatpush3.msra.mxu0 %v3191_v21 }
 0x49b   : > { %2401 = vmatprep.subr.mxu0 %v3003_v4 }
 0x49c   : > { %2402 = vmatpush3.msra.mxu0 %v3195_v23 }
 0x49d   : > { %2403 = vmatprep.subr.mxu0 %v3003_v4 }
 0x49e   : > { %2404 = vmatpush3.msra.mxu0 %v3199_v25 }
 0x49f   : > { %2405 = vmatprep.subr.mxu0 %v3003_v4 }
 0x4a0   : > { %2406 = vmatpush3.msra.mxu0 %v3203_v27 }
 0x4a1   : > { %2407 = vmatprep.subr.mxu0 %v3003_v4 }
 0x4a2   : > { %2408 = vmatpush3.msra.mxu0 %v3207_v29 }
 0x4a3   : > { %2409 = vmatprep.subr.mxu0 %v3003_v4 }
 0x4a4   : > { %2410 = vmatpush3.msra.mxu0 %v3213_v33 }
 0x4a5   : > { %2411 = vmatprep.subr.mxu0 %v3003_v4 }
 0x4a6   : > { %2412 = vmatpush3.msra.mxu0 %v3217_v35 }
 0x4a7   : > { %2451 = vmatprep.subr.mxu0 %v3003_v4 }
 0x547   : > { %v913_v47 = vpop.f32.mrf.mxu0 }
 0x548   : > { %v917_v48 = vadd.f32 %v913_v47, %v390_v46 }
 0x549   : > { %v2345_v49 = vpop.f32.mrf.mxu0 }
 0x54a   : > { %2794 = vtanh.f32 %v917_v48 }
 0x557   : > { %v2795_v50 = vpop.eup %2794 }
 0x558   : > { %2379 = vmatmul.mubr.f32.vlgmr.msra.gmra.mxu1 %v2795_v50 }
 0x559   : > { %2417 = vmatpush3.msra.mxu1 %v3156_v3  ;;  %2448 = vmatprep.mubr.msk.f32.mxu1 %vm3004_vm0, %v3003_v4 }
 0x55a   : > { %2418 = vmatprep.subr.mxu1 %v3003_v4 }
 0x55b   : > { %2419 = vmatpush3.msra.mxu1 %v3159_v5 }
 0x55c   : > { %2420 = vmatprep.subr.mxu1 %v3003_v4 }
 0x55d   : > { %2421 = vmatpush3.msra.mxu1 %v3163_v7 }
 0x55e   : > { %2422 = vmatprep.subr.mxu1 %v3003_v4 }
 0x55f   : > { %2423 = vmatpush3.msra.mxu1 %v3167_v9 }
 0x560   : > { %2424 = vmatprep.subr.mxu1 %v3003_v4 }
 0x561   : > { %2425 = vmatpush3.msra.mxu1 %v3171_v11 }
 0x562   : > { %2426 = vmatprep.subr.mxu1 %v3003_v4 }
 0x563   : > { %2427 = vmatpush3.msra.mxu1 %v3175_v13 }
 0x564   : > { %2428 = vmatprep.subr.mxu1 %v3003_v4 }
 0x565   : > { %2429 = vmatpush3.msra.mxu1 %v3179_v15 }
 0x566   : > { %2430 = vmatprep.subr.mxu1 %v3003_v4 }
 0x567   : > { %2431 = vmatpush3.msra.mxu1 %v3183_v17 }
 0x568   : > { %2432 = vmatprep.subr.mxu1 %v3003_v4 }
 0x569   : > { %2433 = vmatpush3.msra.mxu1 %v3187_v19 }
 0x56a   : > { %2434 = vmatprep.subr.mxu1 %v3003_v4 }
 0x56b   : > { %2435 = vmatpush3.msra.mxu1 %v3191_v21 }
 0x56c   : > { %2436 = vmatprep.subr.mxu1 %v3003_v4 }
 0x56d   : > { %2437 = vmatpush3.msra.mxu1 %v3195_v23 }
 0x56e   : > { %2438 = vmatprep.subr.mxu1 %v3003_v4 }
 0x56f   : > { %2439 = vmatpush3.msra.mxu1 %v3199_v25 }
 0x570   : > { %2440 = vmatprep.subr.mxu1 %v3003_v4 }
 0x571   : > { %2441 = vmatpush3.msra.mxu1 %v3203_v27 }
 0x572   : > { %2442 = vmatprep.subr.mxu1 %v3003_v4 }
 0x573   : > { %2443 = vmatpush3.msra.mxu1 %v3207_v29 }
 0x574   : > { %2444 = vmatprep.subr.mxu1 %v3003_v4 }
 0x575   : > { %2445 = vmatpush3.msra.mxu1 %v3213_v33 }
 0x576   : > { %2446 = vmatprep.subr.mxu1 %v3003_v4 }
 0x577   : > { %2447 = vmatpush3.msra.mxu1 %v3217_v35 }
 0x578   : > { %2486 = vmatprep.subr.mxu1 %v3003_v4 }
 0x618   : > { %v987_v53 = vpop.f32.mrf.mxu1 }
 0x619   : > { %v991_v54 = vadd.f32 %v987_v53, %v395_v51 }
 0x61a   : > { %v2380_v55 = vpop.f32.mrf.mxu1 }
 0x61b   : > { %2796 = vtanh.f32 %v991_v54 }
 0x628   : > { %v2797_v56 = vpop.eup %2796 }
 0x629   : > { %2414 = vmatmul.mubr.f32.vlgmr.msra.gmra.mxu0 %v2797_v56 }
 0x62a   : > { %2452 = vmatpush3.msra.mxu0 %v3156_v3  ;;  %2483 = vmatprep.mubr.msk.f32.mxu0 %vm3004_vm0, %v3003_v4 }
 0x62b   : > { %2453 = vmatprep.subr.mxu0 %v3003_v4 }
 0x62c   : > { %2454 = vmatpush3.msra.mxu0 %v3159_v5 }
 0x62d   : > { %2455 = vmatprep.subr.mxu0 %v3003_v4 }
 0x62e   : > { %2456 = vmatpush3.msra.mxu0 %v3163_v7 }
 0x62f   : > { %2457 = vmatprep.subr.mxu0 %v3003_v4 }
 0x630   : > { %2458 = vmatpush3.msra.mxu0 %v3167_v9 }
 0x631   : > { %2459 = vmatprep.subr.mxu0 %v3003_v4 }
 0x632   : > { %2460 = vmatpush3.msra.mxu0 %v3171_v11 }
 0x633   : > { %2461 = vmatprep.subr.mxu0 %v3003_v4 }
 0x634   : > { %2462 = vmatpush3.msra.mxu0 %v3175_v13 }
 0x635   : > { %2463 = vmatprep.subr.mxu0 %v3003_v4 }
 0x636   : > { %2464 = vmatpush3.msra.mxu0 %v3179_v15 }
 0x637   : > { %2465 = vmatprep.subr.mxu0 %v3003_v4 }
 0x638   : > { %2466 = vmatpush3.msra.mxu0 %v3183_v17 }
 0x639   : > { %2467 = vmatprep.subr.mxu0 %v3003_v4 }
 0x63a   : > { %2468 = vmatpush3.msra.mxu0 %v3187_v19 }
 0x63b   : > { %2469 = vmatprep.subr.mxu0 %v3003_v4 }
 0x63c   : > { %2470 = vmatpush3.msra.mxu0 %v3191_v21 }
 0x63d   : > { %2471 = vmatprep.subr.mxu0 %v3003_v4 }
 0x63e   : > { %2472 = vmatpush3.msra.mxu0 %v3195_v23 }
 0x63f   : > { %2473 = vmatprep.subr.mxu0 %v3003_v4 }
 0x640   : > { %2474 = vmatpush3.msra.mxu0 %v3199_v25 }
 0x641   : > { %2475 = vmatprep.subr.mxu0 %v3003_v4 }
 0x642   : > { %2476 = vmatpush3.msra.mxu0 %v3203_v27 }
 0x643   : > { %2477 = vmatprep.subr.mxu0 %v3003_v4 }
 0x644   : > { %2478 = vmatpush3.msra.mxu0 %v3207_v29 }
 0x645   : > { %2479 = vmatprep.subr.mxu0 %v3003_v4 }
 0x646   : > { %2480 = vmatpush3.msra.mxu0 %v3213_v33 }
 0x647   : > { %2481 = vmatprep.subr.mxu0 %v3003_v4 }
 0x648   : > { %2482 = vmatpush3.msra.mxu0 %v3217_v35 }
 0x649   : > { %2521 = vmatprep.subr.mxu0 %v3003_v4 }
 0x6e9   : > { %v1061_v58 = vpop.f32.mrf.mxu0 }
 0x6ea   : > { %v1065_v59 = vadd.f32 %v1061_v58, %v400_v57 }
 0x6eb   : > { %v2415_v60 = vpop.f32.mrf.mxu0 }
 0x6ec   : > { %2798 = vtanh.f32 %v1065_v59 }
 0x6f9   : > { %v2799_v61 = vpop.eup %2798 }
 0x6fa   : > { %2449 = vmatmul.mubr.f32.vlgmr.msra.gmra.mxu1 %v2799_v61 }
 0x6fb   : > { %2487 = vmatpush3.msra.mxu1 %v3156_v3  ;;  %2518 = vmatprep.mubr.msk.f32.mxu1 %vm3004_vm0, %v3003_v4  ;;  %v405_v3 = vadd.f32 %v3311_v52, %v3360_v2  ;;  %v3656_v2 = vld [vmem:[#allocation9 + $0x40] sm:$0xff] }
 0x6fc   : > { %2488 = vmatprep.subr.mxu1 %v3003_v4 }
 0x6fd   : > { %2489 = vmatpush3.msra.mxu1 %v3159_v5 }
 0x6fe   : > { %2490 = vmatprep.subr.mxu1 %v3003_v4 }
 0x6ff   : > { %2491 = vmatpush3.msra.mxu1 %v3163_v7 }
 0x700   : > { %2492 = vmatprep.subr.mxu1 %v3003_v4 }
 0x701   : > { %2493 = vmatpush3.msra.mxu1 %v3167_v9 }
 0x702   : > { %2494 = vmatprep.subr.mxu1 %v3003_v4 }
 0x703   : > { %2495 = vmatpush3.msra.mxu1 %v3171_v11 }
 0x704   : > { %2496 = vmatprep.subr.mxu1 %v3003_v4 }
 0x705   : > { %2497 = vmatpush3.msra.mxu1 %v3175_v13  ;;  %v3626_v13 = vld [vmem:[#allocation9 + $0x78] sm:$0xff] }
 0x706   : > { %2498 = vmatprep.subr.mxu1 %v3003_v4 }
 0x707   : > { %2499 = vmatpush3.msra.mxu1 %v3179_v15  ;;  %v3632_v15 = vld [vmem:[#allocation9 + $0x70] sm:$0xff] }
 0x708   : > { %2500 = vmatprep.subr.mxu1 %v3003_v4 }
 0x709   : > { %2501 = vmatpush3.msra.mxu1 %v3183_v17  ;;  %v3636_v17 = vld [vmem:[#allocation9 + $0x68] sm:$0xff] }
 0x70a   : > { %2502 = vmatprep.subr.mxu1 %v3003_v4 }
 0x70b   : > { %2503 = vmatpush3.msra.mxu1 %v3187_v19  ;;  %v3640_v19 = vld [vmem:[#allocation9 + $0x60] sm:$0xff] }
 0x70c   : > { %2504 = vmatprep.subr.mxu1 %v3003_v4 }
 0x70d   : > { %2505 = vmatpush3.msra.mxu1 %v3191_v21 }
 0x70e   : > { %2506 = vmatprep.subr.mxu1 %v3003_v4 }
 0x70f   : > { %2507 = vmatpush3.msra.mxu1 %v3195_v23 }
 0x710   : > { %2508 = vmatprep.subr.mxu1 %v3003_v4 }
 0x711   : > { %2509 = vmatpush3.msra.mxu1 %v3199_v25 }
 0x712   : > { %2510 = vmatprep.subr.mxu1 %v3003_v4 }
 0x713   : > { %2511 = vmatpush3.msra.mxu1 %v3203_v27 }
 0x714   : > { %2512 = vmatprep.subr.mxu1 %v3003_v4 }
 0x715   : > { %2513 = vmatpush3.msra.mxu1 %v3207_v29 }
 0x716   : > { %2514 = vmatprep.subr.mxu1 %v3003_v4 }
 0x717   : > { %2515 = vmatpush3.msra.mxu1 %v3213_v33 }
 0x718   : > { %2516 = vmatprep.subr.mxu1 %v3003_v4 }
 0x719   : > { %2517 = vmatpush3.msra.mxu1 %v3217_v35 }
 0x71a   : > { %2556 = vmatprep.subr.mxu1 %v3003_v4 }
 0x7ba   : > { %v1135_v5 = vpop.f32.mrf.mxu1 }
 0x7bb   : > { %v1139_v7 = vadd.f32 %v1135_v5, %v405_v3 }
 0x7bc   : > { %v2450_v9 = vpop.f32.mrf.mxu1 }
 0x7bd   : > { %2800 = vtanh.f32 %v1139_v7 }
 0x7ca   : > { %v2801_v11 = vpop.eup %2800 }
 0x7cb   : > { %2484 = vmatmul.mubr.f32.vlgmr.msra.gmra.mxu0 %v2801_v11 }
 0x7cc   : > { %2522 = vmatpush3.msra.mxu0 %v3626_v13  ;;  %2553 = vmatprep.mubr.msk.f32.mxu0 %vm3004_vm0, %v3003_v4 }
 0x7cd   : > { %2523 = vmatprep.subr.mxu0 %v3003_v4 }
 0x7ce   : > { %2524 = vmatpush3.msra.mxu0 %v3632_v15 }
 0x7cf   : > { %2525 = vmatprep.subr.mxu0 %v3003_v4 }
 0x7d0   : > { %2526 = vmatpush3.msra.mxu0 %v3636_v17 }
 0x7d1   : > { %2527 = vmatprep.subr.mxu0 %v3003_v4 }
 0x7d2   : > { %2528 = vmatpush3.msra.mxu0 %v3640_v19 }
 0x7d3   : > { %2529 = vmatprep.subr.mxu0 %v3003_v4 }
 0x7d4   : > { %2530 = vmatpush3.msra.mxu0 %v3644_v62 }
 0x7d5   : > { %2531 = vmatprep.subr.mxu0 %v3003_v4 }
 0x7d6   : > { %2532 = vmatpush3.msra.mxu0 %v3648_v63 }
 0x7d7   : > { %2533 = vmatprep.subr.mxu0 %v3003_v4 }
 0x7d8   : > { %2534 = vmatpush3.msra.mxu0 %v3652_v0 }
 0x7d9   : > { %2535 = vmatprep.subr.mxu0 %v3003_v4 }
 0x7da   : > { %2536 = vmatpush3.msra.mxu0 %v3656_v2 }
 0x7db   : > { %2537 = vmatprep.subr.mxu0 %v3003_v4 }
 0x7dc   : > { %2538 = vmatpush3.msra.mxu0 %v3660_v18 }
 0x7dd   : > { %2539 = vmatprep.subr.mxu0 %v3003_v4 }
 0x7de   : > { %2540 = vmatpush3.msra.mxu0 %v3191_v21  ;;  %v410_v21 = vadd.f32 %v3358_v1, %v3311_v52  ;;  %v3712_v1 = vld [vmem:[#allocation9 + $0x18] sm:$0xff] }
 0x7df   : > { %2541 = vmatprep.subr.mxu0 %v3003_v4  ;;  %v2832_v52 = vld [vmem:[%s3879_s3] ss:$0 sm:$0xff] }
 0x7e0   : > { %2542 = vmatpush3.msra.mxu0 %v3195_v23  ;;  %v430_v12 = vadd.f32 %v2832_v52, %v3366_v10  ;;  %v435_v48 = vadd.f32 %v2832_v52, %v3372_v16  ;;  %v440_v53 = vadd.f32 %v2832_v52, %v3370_v14 }
 0x7e1   : > { %2543 = vmatprep.subr.mxu0 %v3003_v4 }
 0x7e2   : > { %2544 = vmatpush3.msra.mxu0 %v3199_v25 }
 0x7e3   : > { %2545 = vmatprep.subr.mxu0 %v3003_v4 }
 0x7e4   : > { %2546 = vmatpush3.msra.mxu0 %v3203_v27 }
 0x7e5   : > { %2547 = vmatprep.subr.mxu0 %v3003_v4 }
 0x7e6   : > { %2548 = vmatpush3.msra.mxu0 %v3207_v29  ;;  %v3700_v29 = vld [vmem:[#allocation9 + $0x30] sm:$0xff] }
 0x7e7   : > { %2549 = vmatprep.subr.mxu0 %v3003_v4 }
 0x7e8   : > { %2550 = vmatpush3.msra.mxu0 %v3213_v33  ;;  %v3704_v33 = vld [vmem:[#allocation9 + $0x28] sm:$0xff] }
 0x7e9   : > { %2551 = vmatprep.subr.mxu0 %v3003_v4 }
 0x7ea   : > { %2552 = vmatpush3.msra.mxu0 %v3217_v35  ;;  %v3708_v35 = vld [vmem:[#allocation9 + $0x20] sm:$0xff] }
 0x7eb   : > { %2591 = vmatprep.subr.mxu0 %v3003_v4 }
 0x88b   : > { %v1209_v23 = vpop.f32.mrf.mxu0 }
 0x88c   : > { %v1213_v25 = vadd.f32 %v1209_v23, %v410_v21 }
 0x88d   : > { %v2485_v27 = vpop.f32.mrf.mxu0 }
 0x88e   : > { %2802 = vtanh.f32 %v1213_v25 }
 0x89b   : > { %v2803_v20 = vpop.eup %2802 }
 0x89c   : > { %2519 = vmatmul.mubr.f32.vlgmr.msra.gmra.mxu1 %v2803_v20 }
 0x89d   : > { %2557 = vmatpush3.msra.mxu1 %v3626_v13  ;;  %2588 = vmatprep.mubr.msk.f32.mxu1 %vm3004_vm0, %v3003_v4 }
 0x89e   : > { %2558 = vmatprep.subr.mxu1 %v3003_v4 }
 0x89f   : > { %2559 = vmatpush3.msra.mxu1 %v3632_v15 }
 0x8a0   : > { %2560 = vmatprep.subr.mxu1 %v3003_v4 }
 0x8a1   : > { %2561 = vmatpush3.msra.mxu1 %v3636_v17 }
 0x8a2   : > { %2562 = vmatprep.subr.mxu1 %v3003_v4 }
 0x8a3   : > { %2563 = vmatpush3.msra.mxu1 %v3640_v19 }
 0x8a4   : > { %2564 = vmatprep.subr.mxu1 %v3003_v4 }
 0x8a5   : > { %2565 = vmatpush3.msra.mxu1 %v3644_v62 }
 0x8a6   : > { %2566 = vmatprep.subr.mxu1 %v3003_v4 }
 0x8a7   : > { %2567 = vmatpush3.msra.mxu1 %v3648_v63 }
 0x8a8   : > { %2568 = vmatprep.subr.mxu1 %v3003_v4 }
 0x8a9   : > { %2569 = vmatpush3.msra.mxu1 %v3652_v0 }
 0x8aa   : > { %2570 = vmatprep.subr.mxu1 %v3003_v4 }
 0x8ab   : > { %2571 = vmatpush3.msra.mxu1 %v3656_v2 }
 0x8ac   : > { %2572 = vmatprep.subr.mxu1 %v3003_v4 }
 0x8ad   : > { %2573 = vmatpush3.msra.mxu1 %v3660_v18 }
 0x8ae   : > { %2574 = vmatprep.subr.mxu1 %v3003_v4 }
 0x8af   : > { %2575 = vmatpush3.msra.mxu1 %v3700_v29 }
 0x8b0   : > { %2576 = vmatprep.subr.mxu1 %v3003_v4 }
 0x8b1   : > { %2577 = vmatpush3.msra.mxu1 %v3704_v33 }
 0x8b2   : > { %2578 = vmatprep.subr.mxu1 %v3003_v4 }
 0x8b3   : > { %2579 = vmatpush3.msra.mxu1 %v3708_v35 }
 0x8b4   : > { %2580 = vmatprep.subr.mxu1 %v3003_v4 }
 0x8b5   : > { %2581 = vmatpush3.msra.mxu1 %v3712_v1 }
 0x8b6   : > { %2582 = vmatprep.subr.mxu1 %v3003_v4 }
 0x8b7   : > { %2583 = vmatpush3.msra.mxu1 %v3716_v22 }
 0x8b8   : > { %2584 = vmatprep.subr.mxu1 %v3003_v4 }
 0x8b9   : > { %2585 = vmatpush3.msra.mxu1 %v3720_v24 }
 0x8ba   : > { %2586 = vmatprep.subr.mxu1 %v3003_v4 }
 0x8bb   : > { %2587 = vmatpush3.msra.mxu1 %v3724_v26 }
 0x8bc   : > { %2626 = vmatprep.subr.mxu1 %v3003_v4 }
 0x95c   : > { %v1283_v30 = vpop.f32.mrf.mxu1 }
 0x95d   : > { %v1287_v31 = vadd.f32 %v1283_v30, %v415_v28 }
 0x95e   : > { %v2520_v32 = vpop.f32.mrf.mxu1 }
 0x95f   : > { %2804 = vtanh.f32 %v1287_v31 }
 0x96c   : > { %v2805_v34 = vpop.eup %2804 }
 0x96d   : > { %2554 = vmatmul.mubr.f32.vlgmr.msra.gmra.mxu0 %v2805_v34 }
 0x96e   : > { %2592 = vmatpush3.msra.mxu0 %v3626_v13  ;;  %2623 = vmatprep.mubr.msk.f32.mxu0 %vm3004_vm0, %v3003_v4 }
 0x96f   : > { %2593 = vmatprep.subr.mxu0 %v3003_v4 }
 0x970   : > { %2594 = vmatpush3.msra.mxu0 %v3632_v15 }
 0x971   : > { %2595 = vmatprep.subr.mxu0 %v3003_v4 }
 0x972   : > { %2596 = vmatpush3.msra.mxu0 %v3636_v17 }
 0x973   : > { %2597 = vmatprep.subr.mxu0 %v3003_v4 }
 0x974   : > { %2598 = vmatpush3.msra.mxu0 %v3640_v19 }
 0x975   : > { %2599 = vmatprep.subr.mxu0 %v3003_v4 }
 0x976   : > { %2600 = vmatpush3.msra.mxu0 %v3644_v62 }
 0x977   : > { %2601 = vmatprep.subr.mxu0 %v3003_v4 }
 0x978   : > { %2602 = vmatpush3.msra.mxu0 %v3648_v63 }
 0x979   : > { %2603 = vmatprep.subr.mxu0 %v3003_v4 }
 0x97a   : > { %2604 = vmatpush3.msra.mxu0 %v3652_v0 }
 0x97b   : > { %2605 = vmatprep.subr.mxu0 %v3003_v4 }
 0x97c   : > { %2606 = vmatpush3.msra.mxu0 %v3656_v2 }
 0x97d   : > { %2607 = vmatprep.subr.mxu0 %v3003_v4 }
 0x97e   : > { %2608 = vmatpush3.msra.mxu0 %v3660_v18 }
 0x97f   : > { %2609 = vmatprep.subr.mxu0 %v3003_v4 }
 0x980   : > { %2610 = vmatpush3.msra.mxu0 %v3700_v29 }
 0x981   : > { %2611 = vmatprep.subr.mxu0 %v3003_v4 }
 0x982   : > { %2612 = vmatpush3.msra.mxu0 %v3704_v33 }
 0x983   : > { %2613 = vmatprep.subr.mxu0 %v3003_v4 }
 0x984   : > { %2614 = vmatpush3.msra.mxu0 %v3708_v35 }
 0x985   : > { %2615 = vmatprep.subr.mxu0 %v3003_v4 }
 0x986   : > { %2616 = vmatpush3.msra.mxu0 %v3712_v1 }
 0x987   : > { %2617 = vmatprep.subr.mxu0 %v3003_v4 }
 0x988   : > { %2618 = vmatpush3.msra.mxu0 %v3716_v22 }
 0x989   : > { %2619 = vmatprep.subr.mxu0 %v3003_v4 }
 0x98a   : > { %2620 = vmatpush3.msra.mxu0 %v3720_v24 }
 0x98b   : > { %2621 = vmatprep.subr.mxu0 %v3003_v4 }
 0x98c   : > { %2622 = vmatpush3.msra.mxu0 %v3724_v26 }
 0x98d   : > { %2661 = vmatprep.subr.mxu0 %v3003_v4 }
 0xa2d   : > { %v1357_v36 = vpop.f32.mrf.mxu0 }
 0xa2e   : > { %v1361_v37 = vadd.f32 %v1357_v36, %v420_v8 }
 0xa2f   : > { %v2555_v38 = vpop.f32.mrf.mxu0 }
 0xa30   : > { %2806 = vtanh.f32 %v1361_v37 }
 0xa3d   : > { %v2807_v39 = vpop.eup %2806 }
 0xa3e   : > { %2589 = vmatmul.mubr.f32.vlgmr.msra.gmra.mxu1 %v2807_v39 }
 0xa3f   : > { %2627 = vmatpush3.msra.mxu1 %v3626_v13  ;;  %2658 = vmatprep.mubr.msk.f32.mxu1 %vm3004_vm0, %v3003_v4 }
 0xa40   : > { %2628 = vmatprep.subr.mxu1 %v3003_v4 }
 0xa41   : > { %2629 = vmatpush3.msra.mxu1 %v3632_v15 }
 0xa42   : > { %2630 = vmatprep.subr.mxu1 %v3003_v4 }
 0xa43   : > { %2631 = vmatpush3.msra.mxu1 %v3636_v17 }
 0xa44   : > { %2632 = vmatprep.subr.mxu1 %v3003_v4 }
 0xa45   : > { %2633 = vmatpush3.msra.mxu1 %v3640_v19 }
 0xa46   : > { %2634 = vmatprep.subr.mxu1 %v3003_v4 }
 0xa47   : > { %2635 = vmatpush3.msra.mxu1 %v3644_v62 }
 0xa48   : > { %2636 = vmatprep.subr.mxu1 %v3003_v4 }
 0xa49   : > { %2637 = vmatpush3.msra.mxu1 %v3648_v63 }
 0xa4a   : > { %2638 = vmatprep.subr.mxu1 %v3003_v4 }
 0xa4b   : > { %2639 = vmatpush3.msra.mxu1 %v3652_v0 }
 0xa4c   : > { %2640 = vmatprep.subr.mxu1 %v3003_v4 }
 0xa4d   : > { %2641 = vmatpush3.msra.mxu1 %v3656_v2 }
 0xa4e   : > { %2642 = vmatprep.subr.mxu1 %v3003_v4 }
 0xa4f   : > { %2643 = vmatpush3.msra.mxu1 %v3660_v18 }
 0xa50   : > { %2644 = vmatprep.subr.mxu1 %v3003_v4 }
 0xa51   : > { %2645 = vmatpush3.msra.mxu1 %v3700_v29 }
 0xa52   : > { %2646 = vmatprep.subr.mxu1 %v3003_v4 }
 0xa53   : > { %2647 = vmatpush3.msra.mxu1 %v3704_v33 }
 0xa54   : > { %2648 = vmatprep.subr.mxu1 %v3003_v4 }
 0xa55   : > { %2649 = vmatpush3.msra.mxu1 %v3708_v35 }
 0xa56   : > { %2650 = vmatprep.subr.mxu1 %v3003_v4 }
 0xa57   : > { %2651 = vmatpush3.msra.mxu1 %v3712_v1 }
 0xa58   : > { %2652 = vmatprep.subr.mxu1 %v3003_v4 }
 0xa59   : > { %2653 = vmatpush3.msra.mxu1 %v3716_v22 }
 0xa5a   : > { %2654 = vmatprep.subr.mxu1 %v3003_v4 }
 0xa5b   : > { %2655 = vmatpush3.msra.mxu1 %v3720_v24 }
 0xa5c   : > { %2656 = vmatprep.subr.mxu1 %v3003_v4 }
 0xa5d   : > { %2657 = vmatpush3.msra.mxu1 %v3724_v26 }
 0xafe   : > { %v1431_v40 = vpop.f32.mrf.mxu1 }
 0xaff   : > { %v1435_v41 = vadd.f32 %v1431_v40, %v425_v6 }
 0xb00   : > { %v2590_v42 = vpop.f32.mrf.mxu1 }
 0xb01   : > { %2808 = vtanh.f32 %v1435_v41 }
 0xb0e   : > { %v2809_v43 = vpop.eup %2808 }
 0xb0f   : > { %2624 = vmatmul.mubr.f32.vlgmr.msra.gmra.mxu0 %v2809_v43 }
 0xb10   : > { %2662 = vmatpush3.msra.mxu0 %v3626_v13  ;;  %2693 = vmatprep.mubr.msk.f32.mxu0 %vm3004_vm0, %v3003_v4 }
 0xb11   : > { %2663 = vmatprep.subr.mxu0 %v3003_v4 }
 0xb12   : > { %2664 = vmatpush3.msra.mxu0 %v3632_v15 }
 0xb13   : > { %2665 = vmatprep.subr.mxu0 %v3003_v4 }
 0xb14   : > { %2666 = vmatpush3.msra.mxu0 %v3636_v17 }
 0xb15   : > { %2667 = vmatprep.subr.mxu0 %v3003_v4 }
 0xb16   : > { %2668 = vmatpush3.msra.mxu0 %v3640_v19 }
 0xb17   : > { %2669 = vmatprep.subr.mxu0 %v3003_v4 }
 0xb18   : > { %2670 = vmatpush3.msra.mxu0 %v3644_v62 }
 0xb19   : > { %2671 = vmatprep.subr.mxu0 %v3003_v4 }
 0xb1a   : > { %2672 = vmatpush3.msra.mxu0 %v3648_v63 }
 0xb1b   : > { %2673 = vmatprep.subr.mxu0 %v3003_v4 }
 0xb1c   : > { %2674 = vmatpush3.msra.mxu0 %v3652_v0 }
 0xb1d   : > { %2675 = vmatprep.subr.mxu0 %v3003_v4 }
 0xb1e   : > { %2676 = vmatpush3.msra.mxu0 %v3656_v2 }
 0xb1f   : > { %2677 = vmatprep.subr.mxu0 %v3003_v4 }
 0xb20   : > { %2678 = vmatpush3.msra.mxu0 %v3660_v18 }
 0xb21   : > { %2679 = vmatprep.subr.mxu0 %v3003_v4 }
 0xb22   : > { %2680 = vmatpush3.msra.mxu0 %v3700_v29 }
 0xb23   : > { %2681 = vmatprep.subr.mxu0 %v3003_v4 }
 0xb24   : > { %2682 = vmatpush3.msra.mxu0 %v3704_v33 }
 0xb25   : > { %2683 = vmatprep.subr.mxu0 %v3003_v4 }
 0xb26   : > { %2684 = vmatpush3.msra.mxu0 %v3708_v35 }
 0xb27   : > { %2685 = vmatprep.subr.mxu0 %v3003_v4 }
 0xb28   : > { %2686 = vmatpush3.msra.mxu0 %v3712_v1 }
 0xb29   : > { %2687 = vmatprep.subr.mxu0 %v3003_v4 }
 0xb2a   : > { %2688 = vmatpush3.msra.mxu0 %v3716_v22 }
 0xb2b   : > { %2689 = vmatprep.subr.mxu0 %v3003_v4 }
 0xb2c   : > { %2690 = vmatpush3.msra.mxu0 %v3720_v24 }
 0xb2d   : > { %2691 = vmatprep.subr.mxu0 %v3003_v4 }
 0xb2e   : > { %2692 = vmatpush3.msra.mxu0 %v3724_v26 }
 0xbcf   : > { %v1505_v44 = vpop.f32.mrf.mxu0 }
 0xbd0   : > { %v1509_v45 = vadd.f32 %v1505_v44, %v430_v12 }
 0xbd1   : > { %v2625_v46 = vpop.f32.mrf.mxu0 }
 0xbd2   : > { %2810 = vtanh.f32 %v1509_v45 }
 0xbdf   : > { %v2811_v47 = vpop.eup %2810 }
 0xbe0   : > { %2659 = vmatmul.mubr.f32.vlgmr.msra.gmra.mxu1 %v2811_v47 }
 0xca0   : > { %v1579_v49 = vpop.f32.mrf.mxu1 }
 0xca1   : > { %v1583_v50 = vadd.f32 %v1579_v49, %v435_v48 }
 0xca2   : > { %v2660_v51 = vpop.f32.mrf.mxu1 }
 0xca3   : > { %2812 = vtanh.f32 %v1583_v50 }
 0xcb0   : > { %v2813_v4 = vpop.eup %2812 }
 0xcb1   : > { %2694 = vmatmul.mubr.f32.vlgmr.msra.gmra.mxu0 %v2813_v4 }
 0xd71   : > { %v1653_v54 = vpop.f32.mrf.mxu0 }
 0xd72   : > { %v1657_v55 = vadd.f32 %v1653_v54, %v440_v53 }
 0xd73   : > { %v2695_v56 = vpop.f32.mrf.mxu0 }
 0xd74   : > { %2814 = vtanh.f32 %v1657_v55 }
 0xd7e   : > { %1663 = sbr.rel (%p1770_p1) target bundleno = 3460 (0xd84), region = 56 }
 0xd81   : > { %v2815_v10 = vpop.eup %2814 }
 0xd82   : > { %1659 = vst [vmem:[#allocation2] sm:$0xff] %v2815_v10 }
 0xd83   : > { %1664 = vst [vmem:[#allocation10] sm:$0xff] %v2815_v10 }
 0xd84 PF: > { %p3843_p4 = scmp.eq.s32.totalorder %s1756_s21, 1  ;;  %s3005_s30 = smov [#allocation10]  }
 0xd85   : > { %s1674_s7 = sshll.u32 %s3005_s30, 4  ;;  %s1675_s7 = int_to_ptr.vmem [resolvable:$true] %s1674_s7 }
 0xd86   : > { %s2913_s8 = scalar_lea.vmem %s1675_s7, 128  ;;  %p2920_p10 = scmp.lt.s32.totalorder %s1675_s7, %s1675_s7 }
 0xd87   : > { %p2914_p3 = scmp.ne.s32.totalorder %s1675_s7, %s2913_s8  ;;  %p2921_p11 = scmp.lt.s32.totalorder %s2913_s8, %s2913_s8 }
 0xd89   : > { %p2915_p6 = pnand %p2914_p3, %p3843_p4  ;;  %p2922_p12 = por %p2921_p11, %p2920_p10 }
 0xd8b   : > { %p2916_p7 = pneg %p2915_p6 }
 0xd8d   : > { %p2923_p13 = pnand %p2922_p12, %p2916_p7 }
 0xd8f   : > { %2926 = shalt.err (!%p2923_p13)
}
 0xd90   : > { %2707 = dma.vmem_to_hbm [thread:$0]  (%p3843_p4), %s1675_s7, 128, %s3880_s4, [#allocation6]  }
 0xd91   : > { %2970 = dma.done.wait (%p3843_p4), [#allocation6], 128  }
 0xd92   : > { %2972 = vsyncadd (%p3843_p4), [#allocation6], 4294967168 }
 0xd93 PF: > { %s19_s20 = sadd.s32 1, %s2995_s20   ;;  %s3887_s15 = smov %s2979_s16 }
 0xd94   : > { %p16_p8 = scmp.ge.s32.totalorder %s19_s20, 4   ;;  %s3888_s16 = smov %s2983_s17 }
 0xd95   : > { %s3889_s17 = smov %s3124_s27  ;;  %s3890_s18 = smov %s2991_s19 }
 0xd96   : > { %s3891_s19 = smov %s3893_s12  ;;  %18 = sbr.rel (!%p16_p8) target bundleno = 6 (0x6), region = 105 }
 0xd9b   :  { %1687 = vsyncpa [#allocation5], 1 }
 0xd9c   :  { %1689 = vsyncpa [#allocation5 + $0x1], 1 }
 0xd9d   :  { %1690 = vsyncpa [#allocation8], 1 }
 0xd9e   :  { %1691 = vsyncpa [#allocation6], 1 }
 0xd9f   :  { %1693 = vsyncpa [#allocation6 + $0x1], 1 }

</bundles_post_ra>
